<compile_context>
chip_gen: v5e
topology: v5e:2x2
jax: 0.10.0
libtpu: 0.0.40
codegen_flags: <defaults>
</compile_context>

<pallas_src>
import functools

import jax
import jax.numpy as jnp
from jax import lax
from jax.experimental import pallas as pl
from jax.experimental.pallas import tpu as pltpu


def _round_up(v, m):
    return (v + m - 1) // m * m


def _device_kind():
    try:
        return jax.devices()[0].device_kind.lower()
    except Exception:
        return ""


def _vmem_capacity_bytes():
    try:
        return int(pltpu.get_tpu_info().vmem_capacity_bytes)
    except Exception:
        return 64 * 1024 * 1024          # conservative: v7x per-TensorCore VMEM


def _proto_kernel(x_ref, v_ref, bv_ref, wt_ref, bw_ref,
                  m_out, l_out, acc_out,
                  m_scr, l_scr, acc_scr,
                  *, n_rows, tile_n, num_tiles, tiles_per_split,
                  needs_mask, needs_skip, tanh_bf16):
    c = pl.program_id(0)             # split index ("parallel" -> sharded over TCs)
    i = pl.program_id(1)             # tile index within split ("arbitrary" reduction)
    t = c * tiles_per_split + i      # global tile index along the bag dimension

    @pl.when(i == 0)
    def _init():
        m_scr[...] = jnp.full(m_scr.shape, -jnp.inf, dtype=m_scr.dtype)
        l_scr[...] = jnp.zeros(l_scr.shape, dtype=l_scr.dtype)
        acc_scr[...] = jnp.zeros(acc_scr.shape, dtype=acc_scr.dtype)

    def _accumulate():
        x = x_ref[...]                                         # (TILE_N, L) bf16

        if needs_mask:
            # Only the last global tile holds out-of-bag rows (possibly non-finite
            # block-padding garbage). Zero them there only: lax.cond -> the full-tile
            # select is paid on a single grid step, not every step.
            def _mask_rows(xx):
                row = lax.broadcasted_iota(jnp.int32, (tile_n, 1), 0) + t * tile_n
                return jnp.where(row < n_rows, xx, jnp.zeros_like(xx))
            x = lax.cond(t == num_tiles - 1, _mask_rows, lambda xx: xx, x)

        # Attention head, fused into the single pass over x.
        xv = jnp.dot(x, v_ref[...], preferred_element_type=jnp.float32) + bv_ref[...]
        if tanh_bf16:
            h = jnp.tanh(xv.astype(jnp.bfloat16))              # bf16 EUP path (v6e/v7x)
        else:
            h = jnp.tanh(xv).astype(wt_ref.dtype)              # f32 EUP (v5e), cast for MXU

        # Lane-dense logits: (K, TILE_N) = Wt(K,D) x h(TILE_N,D), contracting D of both
        # (native "trans_b" MXU contraction; no XLU transpose of h).
        s = lax.dot_general(wt_ref[...], h,
                            dimension_numbers=(((1,), (1,)), ((), ())),
                            preferred_element_type=jnp.float32) + bw_ref[...]

        if needs_mask:
            # Cheap: (K, TILE_N) is lane-dense, a handful of vregs per step.
            col = lax.broadcasted_iota(jnp.int32, s.shape, 1) + t * tile_n
            s = jnp.where(col < n_rows, s, -jnp.inf)

        # Online softmax over the bag (lane) axis, accumulated across grid steps.
        # m_new is always finite: every executed tile contains >= 1 in-bag row.
        m_prev = m_scr[...]                                    # (K, 1)
        m_new = jnp.maximum(m_prev, jnp.max(s, axis=1, keepdims=True))
        alpha = jnp.exp(m_prev - m_new)                        # (K, 1)
        p = jnp.exp(s - m_new)                                 # (K, TILE_N); 0 where masked
        m_scr[...] = m_new
        l_scr[...] = alpha * l_scr[...] + jnp.sum(p, axis=1, keepdims=True)
        acc_scr[...] = alpha * acc_scr[...] + jnp.dot(
            p.astype(x.dtype), x, preferred_element_type=jnp.float32)   # (K, L)

    if needs_skip:
        # Last split may cover fewer real tiles; its clamped duplicate fetch is skipped.
        pl.when(t < num_tiles)(_accumulate)
    else:
        _accumulate()

    @pl.when(i == pl.num_programs(1) - 1)
    def _finalize():
        # Stats broadcast to 128 lanes so the (one-time) store is lane-dense.
        m_out[...] = jnp.broadcast_to(m_scr[...], m_out.shape)
        l_out[...] = jnp.broadcast_to(l_scr[...], l_out.shape)
        acc_out[...] = acc_scr[...]


def prototype_model_forward(x, params, *, tile_n=2048, num_splits=None,
                            compute_dtype=jnp.bfloat16, tanh_bf16=None):
    """x: (N, L). params = (V, bv, W, bw, Wc, bc), Linear weights stored transposed
    (in_features, out_features). Returns (afeat (K, L) f32, pred (K, num_cls) f32)."""
    V, bv, W, bw, Wc, bc = params
    N, L = x.shape
    D = V.shape[1]
    K = W.shape[1]

    kind = _device_kind()
    phys_vmem = _vmem_capacity_bytes()
    if tanh_bf16 is None:
        # bf16 EUP fast path exists on v6e/v7x; v5e (and older) EUP is f32-only.
        tanh_bf16 = not any(v in kind for v in ("v2", "v3", "v4", "v5"))

    itemsize = jnp.dtype(compute_dtype).itemsize

    # ---- bag tiling: big 128-aligned tiles (HBM-bound kernel), clamped to VMEM ----
    tile_n = max(128, _round_up(min(tile_n, _round_up(N, 128)), 128))
    max_tile_bytes = max(int(0.35 * phys_vmem), 1 << 20)
    while tile_n > 256 and 2 * tile_n * L * itemsize > max_tile_bytes:
        tile_n = max(128, _round_up(tile_n // 2, 128))
    num_tiles = pl.cdiv(N, tile_n)
    needs_mask = (N % tile_n) != 0

    # ---- split the bag reduction across TensorCores (v4/v5p/v7x megacore) --------
    if num_splits is None:
        multi_core = any(v in kind for v in ("v4", "v5p", "v7", "tpu7"))
        num_splits = 2 if (multi_core and num_tiles >= 2) else 1
    num_splits = max(1, min(int(num_splits), num_tiles))
    tiles_per_split = pl.cdiv(num_tiles, num_splits)
    needs_skip = (num_splits * tiles_per_split) != num_tiles

    if needs_skip:
        def x_index_map(c, i):
            return (jnp.minimum(c * tiles_per_split + i, num_tiles - 1), 0)
    else:
        def x_index_map(c, i):
            return (c * tiles_per_split + i, 0)

    # ---- operands: bf16 MXU inputs, f32 biases; W pre-transposed to (K, D) --------
    x_c = x.astype(compute_dtype)
    V_c = V.astype(compute_dtype)
    Wt_c = W.T.astype(compute_dtype)                       # (K, D)
    bv_c = jnp.asarray(bv, jnp.float32).reshape(1, D)
    bw_c = jnp.asarray(bw, jnp.float32).reshape(K, 1)

    in_specs = [
        pl.BlockSpec((tile_n, L), x_index_map),            # x: streamed / pipelined
        pl.BlockSpec((L, D), lambda c, i: (0, 0)),         # V (resident)
        pl.BlockSpec((1, D), lambda c, i: (0, 0)),         # bv
        pl.BlockSpec((K, D), lambda c, i: (0, 0)),         # W^T
        pl.BlockSpec((K, 1), lambda c, i: (0, 0)),         # bw
    ]
    out_specs = (
        pl.BlockSpec((None, K, 128), lambda c, i: (c, 0, 0)),   # partial m (broadcast)
        pl.BlockSpec((None, K, 128), lambda c, i: (c, 0, 0)),   # partial l (broadcast)
        pl.BlockSpec((None, K, L), lambda c, i: (c, 0, 0)),     # partial unnormalized afeat
    )
    scratch_shapes = [
        pltpu.VMEM((K, 1), jnp.float32),                   # running max m
        pltpu.VMEM((K, 1), jnp.float32),                   # running sum l
        pltpu.VMEM((K, L), jnp.float32),                   # unnormalized afeat accumulator
    ]

    # VMEM budget: x tile double-buffered; resident weights counted twice (default
    # double buffering) for safety; limit derived from the chip's physical VMEM.
    vmem_est = (2 * tile_n * L * itemsize
                + 2 * (L * D + K * D) * itemsize
                + 2 * (D + K) * 4
                + (K * L + 2 * K) * 4
                + 2 * num_splits * (K * L + 2 * K * 128) * 4)
    vmem_limit = int(min(max(2 * vmem_est, 16 * 1024 * 1024), int(0.6 * phys_vmem)))
    vmem_limit = int(min(max(vmem_limit, int(1.25 * vmem_est)), int(0.9 * phys_vmem)))

    cost = pl.CostEstimate(
        flops=2 * N * L * D + 2 * N * D * K + 2 * N * K * L,
        transcendentals=N * (D + K),
        bytes_accessed=(x_c.size * itemsize + (L * D + K * D) * itemsize
                        + (D + K) * 4 + num_splits * (K * L + 2 * K * 128) * 4),
    )

    kernel = functools.partial(
        _proto_kernel, n_rows=N, tile_n=tile_n, num_tiles=num_tiles,
        tiles_per_split=tiles_per_split, needs_mask=needs_mask,
        needs_skip=needs_skip, tanh_bf16=tanh_bf16)

    m_p, l_p, acc_p = pl.pallas_call(
        kernel,
        out_shape=(
            jax.ShapeDtypeStruct((num_splits, K, 128), jnp.float32),
            jax.ShapeDtypeStruct((num_splits, K, 128), jnp.float32),
            jax.ShapeDtypeStruct((num_splits, K, L), jnp.float32),
        ),
        grid_spec=pltpu.PrefetchScalarGridSpec(
            num_scalar_prefetch=0,
            grid=(num_splits, tiles_per_split),
            in_specs=in_specs,
            out_specs=out_specs,
            scratch_shapes=scratch_shapes,
        ),
        compiler_params=pltpu.CompilerParams(
            dimension_semantics=("parallel", "arbitrary"),
            vmem_limit_bytes=vmem_limit,
        ),
        cost_estimate=cost,
    )(x_c, V_c, bv_c, Wt_c, bw_c)

    # ---- tiny exact-f32 epilogue: combine splits, normalize, classify ------------
    m_p = m_p[:, :, :1]                                    # (S, K, 1)
    l_p = l_p[:, :, :1]                                    # (S, K, 1)
    m = jnp.max(m_p, axis=0)                               # (K, 1)
    scale = jnp.exp(m_p - m)                               # (S, K, 1)
    l = jnp.sum(l_p * scale, axis=0)                       # (K, 1)
    acc = jnp.sum(acc_p * scale, axis=0)                   # (K, L)
    afeat = acc / l                                        # exact divide (no approx recip)
    pred = afeat @ Wc.astype(jnp.float32) + jnp.asarray(bc, jnp.float32).reshape(1, -1)
    return afeat, pred


def make_params(key, L, D, K, num_cls):
    """Deterministic synthetic parameters (PyTorch nn.Linear shapes, stored transposed)."""
    k1, k2, k3, k4, k5, k6 = jax.random.split(key, 6)
    V = jax.random.normal(k1, (L, D), jnp.float32) * 0.05          # attention Linear(L, D).weight^T
    bv = jax.random.normal(k2, (1, D), jnp.float32) * 0.05
    W = jax.random.normal(k3, (D, K), jnp.float32) * 0.05           # attention Linear(D, K).weight^T
    bw = jax.random.normal(k4, (1, K), jnp.float32) * 0.05
    Wc = jax.random.normal(k5, (L, num_cls), jnp.float32) * 0.05    # classifier Linear(L, num_cls).weight^T
    bc = jax.random.normal(k6, (1, num_cls), jnp.float32) * 0.05
    return (V, bv, W, bw, Wc, bc)


def _reference(x, params):
    V, bv, W, bw, Wc, bc = params
    h = jnp.tanh(x @ V + bv)
    logits = h @ W + bw
    aa = jax.nn.softmax(logits.T, axis=1)
    afeat = aa @ x
    pred = afeat @ Wc + bc
    return afeat, pred


if __name__ == "__main__":
    # Small shapes consistent with the module (scaled-down L; K=1, num_cls=2).
    N, L, D, K, NUM_CLS = 300, 256, 128, 1, 2

    key = jax.random.PRNGKey(0)
    kx, kp = jax.random.split(key)
    x = jax.random.normal(kx, (N, L), jnp.float32)
    params = make_params(kp, L, D, K, NUM_CLS)

    afeat_ref, pred_ref = _reference(x, params)

    # 1) Default config (tile auto-clamped for this small bag; split auto-detected).
    afeat, pred = prototype_model_forward(x, params)
    jax.block_until_ready((afeat, pred))
    assert afeat.shape == (K, L) and pred.shape == (K, NUM_CLS)
    assert jnp.allclose(afeat, afeat_ref, atol=2e-2, rtol=2e-2), \
        float(jnp.max(jnp.abs(afeat - afeat_ref)))
    assert jnp.allclose(pred, pred_ref, atol=2e-2, rtol=2e-2), \
        float(jnp.max(jnp.abs(pred - pred_ref)))

    # 2) Small tile + forced 2-way split: exercises multi-tile online softmax,
    #    the cross-split combine, the clamped-skip path and the ragged last tile.
    afeat2, pred2 = prototype_model_forward(x, params, tile_n=128, num_splits=2)
    jax.block_until_ready((afeat2, pred2))
    assert jnp.allclose(afeat2, afeat_ref, atol=2e-2, rtol=2e-2), \
        float(jnp.max(jnp.abs(afeat2 - afeat_ref)))
    assert jnp.allclose(pred2, pred_ref, atol=2e-2, rtol=2e-2), \
        float(jnp.max(jnp.abs(pred2 - pred_ref)))

    print("KERNEL_OK")
</pallas_src>

<mosaic_0001>
module attributes {stable_mosaic.version = 11 : i64} {
  func.func @_proto_kernel(%arg0: i32, %arg1: i32, %arg2: memref<384x256xbf16, #tpu.memory_space<vmem>>, %arg3: memref<256x128xbf16, #tpu.memory_space<vmem>>, %arg4: memref<1x128xf32, #tpu.memory_space<vmem>>, %arg5: memref<1x128xbf16, #tpu.memory_space<vmem>>, %arg6: memref<1x1xf32, #tpu.memory_space<vmem>>, %arg7: memref<1x1x128xf32, #tpu.memory_space<vmem>>, %arg8: memref<1x1x128xf32, #tpu.memory_space<vmem>>, %arg9: memref<1x1x256xf32, #tpu.memory_space<vmem>>, %arg10: memref<1x1xf32, #tpu.memory_space<vmem>>, %arg11: memref<1x1xf32, #tpu.memory_space<vmem>>, %arg12: memref<1x256xf32, #tpu.memory_space<vmem>>) attributes {dimension_semantics = [#tpu.dimension_semantics<parallel>, #tpu.dimension_semantics<arbitrary>], iteration_bounds = array<i64: 1, 1>, scalar_prefetch = 0 : i64, scratch_operands = 3 : i64, tpu.core_type = #tpu.core_type<tc>, window_params = [{transform_indices = @transform_0, window_bounds = array<i64: 384, 256>}, {pipeline_mode = #tpu.pipeline_mode<synchronous>, transform_indices = @transform_1, window_bounds = array<i64: 256, 128>}, {pipeline_mode = #tpu.pipeline_mode<synchronous>, transform_indices = @transform_2, window_bounds = array<i64: 1, 128>}, {pipeline_mode = #tpu.pipeline_mode<synchronous>, transform_indices = @transform_3, window_bounds = array<i64: 1, 128>}, {pipeline_mode = #tpu.pipeline_mode<synchronous>, transform_indices = @transform_4, window_bounds = array<i64: 1, 1>}, {transform_indices = @transform_5, window_bounds = array<i64: 1, 1, 128>}, {transform_indices = @transform_6, window_bounds = array<i64: 1, 1, 128>}, {transform_indices = @transform_7, window_bounds = array<i64: 1, 1, 256>}]} {
    %c1_i32 = arith.constant 1 : i32
    %0 = arith.muli %arg0, %c1_i32 : i32
    %1 = arith.addi %0, %arg1 : i32
    %c0_i32 = arith.constant 0 : i32
    %2 = arith.cmpi eq, %arg1, %c0_i32 : i32
    %3 = arith.extui %2 : i1 to i32
    %c0_i32_0 = arith.constant 0 : i32
    %4 = arith.cmpi ne, %3, %c0_i32_0 : i32
    scf.if %4 {
      %cst_31 = arith.constant 0xFF800000 : f32
      %56 = vector.broadcast %cst_31 : f32 to vector<1x1xf32>
      %c0_32 = arith.constant 0 : index
      %c0_33 = arith.constant 0 : index
      %57 = vector.load %arg10[%c0_32, %c0_33] : memref<1x1xf32, #tpu.memory_space<vmem>>, vector<1x1xf32>
      tpu.vector_store %arg10[%c0_32, %c0_33], %56 {strides = array<i32>} : memref<1x1xf32, #tpu.memory_space<vmem>>, vector<1x1xf32>,
      %cst_34 = arith.constant 0.000000e+00 : f32
      %58 = vector.broadcast %cst_34 : f32 to vector<1x1xf32>
      %c0_35 = arith.constant 0 : index
      %c0_36 = arith.constant 0 : index
      %59 = vector.load %arg11[%c0_35, %c0_36] : memref<1x1xf32, #tpu.memory_space<vmem>>, vector<1x1xf32>
      tpu.vector_store %arg11[%c0_35, %c0_36], %58 {strides = array<i32>} : memref<1x1xf32, #tpu.memory_space<vmem>>, vector<1x1xf32>,
      %cst_37 = arith.constant 0.000000e+00 : f32
      %60 = vector.broadcast %cst_37 : f32 to vector<1x256xf32>
      %c0_38 = arith.constant 0 : index
      %c0_39 = arith.constant 0 : index
      %61 = vector.load %arg12[%c0_38, %c0_39] : memref<1x256xf32, #tpu.memory_space<vmem>>, vector<1x256xf32>
      tpu.vector_store %arg12[%c0_38, %c0_39], %60 {strides = array<i32>} : memref<1x256xf32, #tpu.memory_space<vmem>>, vector<1x256xf32>,
    } else {
    }
    %c0 = arith.constant 0 : index
    %c0_1 = arith.constant 0 : index
    %5 = vector.load %arg2[%c0, %c0_1] : memref<384x256xbf16, #tpu.memory_space<vmem>>, vector<384x256xbf16>
    %c0_i32_2 = arith.constant 0 : i32
    %6 = arith.cmpi eq, %1, %c0_i32_2 : i32
    %7 = arith.extui %6 : i1 to i32
    %c0_i32_3 = arith.constant 0 : i32
    %8 = arith.cmpi ne, %7, %c0_i32_3 : i32
    %9 = scf.if %8 -> (vector<384x256xbf16>) {
      %56 = tpu.iota {dimensions = array<i32: 0>} : vector<384x1xi32>
      %c384_i32_31 = arith.constant 384 : i32
      %57 = arith.muli %1, %c384_i32_31 : i32
      %58 = vector.broadcast %57 : i32 to vector<384x1xi32>
      %59 = arith.addi %56, %58 : vector<384x1xi32>
      %c300_i32_32 = arith.constant 300 : i32
      %60 = vector.broadcast %c300_i32_32 : i32 to vector<384x1xi32>
      %61 = arith.cmpi slt, %59, %60 : vector<384x1xi32>
      %cst_33 = arith.constant 0.000000e+00 : bf16
      %62 = vector.broadcast %cst_33 : bf16 to vector<384x256xbf16>
      %63 = vector.shape_cast %61 : vector<384x1xi1> to vector<384x1xi1>
      %64 = vector.broadcast %63 : vector<384x1xi1> to vector<384x256xi1>
      %65 = arith.select %64, %5, %62 : vector<384x256xi1>, vector<384x256xbf16>
      scf.yield %65 : vector<384x256xbf16>
    } else {
      scf.yield %5 : vector<384x256xbf16>
    }
    %c0_4 = arith.constant 0 : index
    %c0_5 = arith.constant 0 : index
    %10 = vector.load %arg3[%c0_4, %c0_5] : memref<256x128xbf16, #tpu.memory_space<vmem>>, vector<256x128xbf16>
    %cst = arith.constant dense<0.000000e+00> : vector<384x128xf32>
    %11 = tpu.matmul %9, %10, %cst {dimension_numbers = #tpu.dot_dimension_numbers<[1], [0], [0], [1], [0, 0, 1, 1], [], []>} : vector<384x256xbf16>, vector<256x128xbf16>, vector<384x128xf32> -> vector<384x128xf32>
    %c0_6 = arith.constant 0 : index
    %c0_7 = arith.constant 0 : index
    %12 = vector.load %arg4[%c0_6, %c0_7] : memref<1x128xf32, #tpu.memory_space<vmem>>, vector<1x128xf32>
    %13 = vector.broadcast %12 : vector<1x128xf32> to vector<384x128xf32>
    %14 = arith.addf %11, %13 : vector<384x128xf32>
    %15 = arith.truncf %14 : vector<384x128xf32> to vector<384x128xbf16>
    %16 = math.tanh %15 : vector<384x128xbf16>
    %c0_8 = arith.constant 0 : index
    %c0_9 = arith.constant 0 : index
    %17 = vector.load %arg5[%c0_8, %c0_9] : memref<1x128xbf16, #tpu.memory_space<vmem>>, vector<1x128xbf16>
    %cst_10 = arith.constant dense<0.000000e+00> : vector<1x384xf32>
    %18 = tpu.matmul %17, %16, %cst_10 {dimension_numbers = #tpu.dot_dimension_numbers<[1], [1], [0], [0], [0, 0, 1, 0], [], []>} : vector<1x128xbf16>, vector<384x128xbf16>, vector<1x384xf32> -> vector<1x384xf32>
    %c0_11 = arith.constant 0 : index
    %c0_12 = arith.constant 0 : index
    %19 = vector.load %arg6[%c0_11, %c0_12] : memref<1x1xf32, #tpu.memory_space<vmem>>, vector<1x1xf32>
    %20 = vector.broadcast %19 : vector<1x1xf32> to vector<1x384xf32>
    %21 = arith.addf %18, %20 : vector<1x384xf32>
    %22 = tpu.iota {dimensions = array<i32: 1>} : vector<1x384xi32>
    %c384_i32 = arith.constant 384 : i32
    %23 = arith.muli %1, %c384_i32 : i32
    %24 = vector.broadcast %23 : i32 to vector<1x384xi32>
    %25 = arith.addi %22, %24 : vector<1x384xi32>
    %c300_i32 = arith.constant 300 : i32
    %26 = vector.broadcast %c300_i32 : i32 to vector<1x384xi32>
    %27 = arith.cmpi slt, %25, %26 : vector<1x384xi32>
    %cst_13 = arith.constant 0xFF800000 : f32
    %28 = vector.broadcast %cst_13 : f32 to vector<1x384xf32>
    %29 = arith.select %27, %21, %28 : vector<1x384xi1>, vector<1x384xf32>
    %c0_14 = arith.constant 0 : index
    %c0_15 = arith.constant 0 : index
    %30 = vector.load %arg10[%c0_14, %c0_15] : memref<1x1xf32, #tpu.memory_space<vmem>>, vector<1x1xf32>
    %cst_16 = arith.constant dense<0xFF800000> : vector<1xf32>
    %31 = vector.multi_reduction <maximumf>, %29, %cst_16 [1] : vector<1x384xf32> to vector<1xf32>
    %32 = vector.shape_cast %31 : vector<1xf32> to vector<1x1xf32>
    %33 = arith.maximumf %30, %32 : vector<1x1xf32>
    %34 = arith.subf %30, %33 : vector<1x1xf32>
    %35 = math.exp %34 : vector<1x1xf32>
    %36 = vector.broadcast %33 : vector<1x1xf32> to vector<1x384xf32>
    %37 = arith.subf %29, %36 : vector<1x384xf32>
    %38 = math.exp %37 : vector<1x384xf32>
    %c0_17 = arith.constant 0 : index
    %c0_18 = arith.constant 0 : index
    %39 = vector.load %arg10[%c0_17, %c0_18] : memref<1x1xf32, #tpu.memory_space<vmem>>, vector<1x1xf32>
    tpu.vector_store %arg10[%c0_17, %c0_18], %33 {strides = array<i32>} : memref<1x1xf32, #tpu.memory_space<vmem>>, vector<1x1xf32>,
    %c0_19 = arith.constant 0 : index
    %c0_20 = arith.constant 0 : index
    %40 = vector.load %arg11[%c0_19, %c0_20] : memref<1x1xf32, #tpu.memory_space<vmem>>, vector<1x1xf32>
    %41 = arith.mulf %35, %40 : vector<1x1xf32>
    %cst_21 = arith.constant dense<0.000000e+00> : vector<1xf32>
    %42 = vector.multi_reduction <add>, %38, %cst_21 [1] : vector<1x384xf32> to vector<1xf32>
    %43 = vector.shape_cast %42 : vector<1xf32> to vector<1x1xf32>
    %44 = arith.addf %41, %43 : vector<1x1xf32>
    %c0_22 = arith.constant 0 : index
    %c0_23 = arith.constant 0 : index
    %45 = vector.load %arg11[%c0_22, %c0_23] : memref<1x1xf32, #tpu.memory_space<vmem>>, vector<1x1xf32>
    tpu.vector_store %arg11[%c0_22, %c0_23], %44 {strides = array<i32>} : memref<1x1xf32, #tpu.memory_space<vmem>>, vector<1x1xf32>,
    %c0_24 = arith.constant 0 : index
    %c0_25 = arith.constant 0 : index
    %46 = vector.load %arg12[%c0_24, %c0_25] : memref<1x256xf32, #tpu.memory_space<vmem>>, vector<1x256xf32>
    %47 = vector.broadcast %35 : vector<1x1xf32> to vector<1x256xf32>
    %48 = arith.mulf %47, %46 : vector<1x256xf32>
    %49 = arith.truncf %38 : vector<1x384xf32> to vector<1x384xbf16>
    %cst_26 = arith.constant dense<0.000000e+00> : vector<1x256xf32>
    %50 = tpu.matmul %49, %9, %cst_26 {dimension_numbers = #tpu.dot_dimension_numbers<[1], [0], [0], [1], [0, 0, 1, 1], [], []>} : vector<1x384xbf16>, vector<384x256xbf16>, vector<1x256xf32> -> vector<1x256xf32>
    %51 = arith.addf %48, %50 : vector<1x256xf32>
    %c0_27 = arith.constant 0 : index
    %c0_28 = arith.constant 0 : index
    %52 = vector.load %arg12[%c0_27, %c0_28] : memref<1x256xf32, #tpu.memory_space<vmem>>, vector<1x256xf32>
    tpu.vector_store %arg12[%c0_27, %c0_28], %51 {strides = array<i32>} : memref<1x256xf32, #tpu.memory_space<vmem>>, vector<1x256xf32>,
    %c0_i32_29 = arith.constant 0 : i32
    %53 = arith.cmpi eq, %arg1, %c0_i32_29 : i32
    %54 = arith.extui %53 : i1 to i32
    %c0_i32_30 = arith.constant 0 : i32
    %55 = arith.cmpi ne, %54, %c0_i32_30 : i32
    scf.if %55 {
      %c0_31 = arith.constant 0 : index
      %c0_32 = arith.constant 0 : index
      %56 = vector.load %arg10[%c0_31, %c0_32] : memref<1x1xf32, #tpu.memory_space<vmem>>, vector<1x1xf32>
      %57 = vector.shape_cast %56 : vector<1x1xf32> to vector<1x1xf32>
      %58 = vector.broadcast %57 : vector<1x1xf32> to vector<1x128xf32>
      %c0_33 = arith.constant 0 : index
      %c0_34 = arith.constant 0 : index
      %c0_35 = arith.constant 0 : index
      %59 = vector.load %arg7[%c0_33, %c0_34, %c0_35] : memref<1x1x128xf32, #tpu.memory_space<vmem>>, vector<1x1x128xf32>
      %60 = vector.shape_cast %59 : vector<1x1x128xf32> to vector<1x128xf32>
      %61 = vector.shape_cast %58 : vector<1x128xf32> to vector<1x1x128xf32>
      tpu.vector_store %arg7[%c0_33, %c0_34, %c0_35], %61 {strides = array<i32>} : memref<1x1x128xf32, #tpu.memory_space<vmem>>, vector<1x1x128xf32>,
      %c0_36 = arith.constant 0 : index
      %c0_37 = arith.constant 0 : index
      %62 = vector.load %arg11[%c0_36, %c0_37] : memref<1x1xf32, #tpu.memory_space<vmem>>, vector<1x1xf32>
      %63 = vector.shape_cast %62 : vector<1x1xf32> to vector<1x1xf32>
      %64 = vector.broadcast %63 : vector<1x1xf32> to vector<1x128xf32>
      %c0_38 = arith.constant 0 : index
      %c0_39 = arith.constant 0 : index
      %c0_40 = arith.constant 0 : index
      %65 = vector.load %arg8[%c0_38, %c0_39, %c0_40] : memref<1x1x128xf32, #tpu.memory_space<vmem>>, vector<1x1x128xf32>
      %66 = vector.shape_cast %65 : vector<1x1x128xf32> to vector<1x128xf32>
      %67 = vector.shape_cast %64 : vector<1x128xf32> to vector<1x1x128xf32>
      tpu.vector_store %arg8[%c0_38, %c0_39, %c0_40], %67 {strides = array<i32>} : memref<1x1x128xf32, #tpu.memory_space<vmem>>, vector<1x1x128xf32>,
      %c0_41 = arith.constant 0 : index
      %c0_42 = arith.constant 0 : index
      %68 = vector.load %arg12[%c0_41, %c0_42] : memref<1x256xf32, #tpu.memory_space<vmem>>, vector<1x256xf32>
      %c0_43 = arith.constant 0 : index
      %c0_44 = arith.constant 0 : index
      %c0_45 = arith.constant 0 : index
      %69 = vector.load %arg9[%c0_43, %c0_44, %c0_45] : memref<1x1x256xf32, #tpu.memory_space<vmem>>, vector<1x1x256xf32>
      %70 = vector.shape_cast %69 : vector<1x1x256xf32> to vector<1x256xf32>
      %71 = vector.shape_cast %68 : vector<1x256xf32> to vector<1x1x256xf32>
      tpu.vector_store %arg9[%c0_43, %c0_44, %c0_45], %71 {strides = array<i32>} : memref<1x1x256xf32, #tpu.memory_space<vmem>>, vector<1x1x256xf32>,
    } else {
    }
    return
  }
  func.func @transform_0(%arg0: i32, %arg1: i32) -> (i32, i32) {
    %c1_i32 = arith.constant 1 : i32
    %0 = arith.muli %arg0, %c1_i32 : i32
    %1 = arith.addi %0, %arg1 : i32
    %c0_i32 = arith.constant 0 : i32
    %c0_i32_0 = arith.constant 0 : i32
    return %1, %c0_i32 : i32, i32
  }
  func.func @transform_1(%arg0: i32, %arg1: i32) -> (i32, i32) {
    %c0_i32 = arith.constant 0 : i32
    %c0_i32_0 = arith.constant 0 : i32
    %c0_i32_1 = arith.constant 0 : i32
    return %c0_i32, %c0_i32_0 : i32, i32
  }
  func.func @transform_2(%arg0: i32, %arg1: i32) -> (i32, i32) {
    %c0_i32 = arith.constant 0 : i32
    %c0_i32_0 = arith.constant 0 : i32
    %c0_i32_1 = arith.constant 0 : i32
    return %c0_i32, %c0_i32_0 : i32, i32
  }
  func.func @transform_3(%arg0: i32, %arg1: i32) -> (i32, i32) {
    %c0_i32 = arith.constant 0 : i32
    %c0_i32_0 = arith.constant 0 : i32
    %c0_i32_1 = arith.constant 0 : i32
    return %c0_i32, %c0_i32_0 : i32, i32
  }
  func.func @transform_4(%arg0: i32, %arg1: i32) -> (i32, i32) {
    %c0_i32 = arith.constant 0 : i32
    %c0_i32_0 = arith.constant 0 : i32
    %c0_i32_1 = arith.constant 0 : i32
    return %c0_i32, %c0_i32_0 : i32, i32
  }
  func.func @transform_5(%arg0: i32, %arg1: i32) -> (i32, i32, i32) {
    %c0_i32 = arith.constant 0 : i32
    %c0_i32_0 = arith.constant 0 : i32
    %c0_i32_1 = arith.constant 0 : i32
    return %arg0, %c0_i32, %c0_i32_0 : i32, i32, i32
  }
  func.func @transform_6(%arg0: i32, %arg1: i32) -> (i32, i32, i32) {
    %c0_i32 = arith.constant 0 : i32
    %c0_i32_0 = arith.constant 0 : i32
    %c0_i32_1 = arith.constant 0 : i32
    return %arg0, %c0_i32, %c0_i32_0 : i32, i32, i32
  }
  func.func @transform_7(%arg0: i32, %arg1: i32) -> (i32, i32, i32) {
    %c0_i32 = arith.constant 0 : i32
    %c0_i32_0 = arith.constant 0 : i32
    %c0_i32_1 = arith.constant 0 : i32
    return %arg0, %c0_i32, %c0_i32_0 : i32, i32, i32
  }
}

</mosaic_0001>

<bundles_post_ra>
// kernel: tpu_custom_call.1
= control target key start
LH: loop header
LB: loop body
LE: loop exit
PB: predicated region body
PF: predicated region fallthrough
CT: control target
= control target key end

     0   :  { %s2506_s0 = inlined_call_operand.hbm [shape: bf16[300,256], index: 0, kind: input, shape index: {}]   ;;  %s2507_s1 = inlined_call_operand.hbm [shape: bf16[256,128], index: 1, kind: input, shape index: {}]   ;;  %s2508_s2 = inlined_call_operand.vmem [shape: f32[1,128], index: 2, kind: input, shape index: {}]   ;;  %s2509_s3 = inlined_call_operand.vmem [shape: bf16[1,128], index: 3, kind: input, shape index: {}]   ;;  %s2510_s4 = inlined_call_operand.<no memory space> [shape: f32[1,1], index: 4, kind: input, shape index: {}]   ;;  %s2511_s5 = inlined_call_operand.hbm [shape: f32[1,1,128], index: 5, kind: output, shape index: {0}]   ;;  %s2512_s6 = inlined_call_operand.hbm [shape: f32[1,1,128], index: 6, kind: output, shape index: {1}]   ;;  %s2513_s7 = inlined_call_operand.hbm [shape: f32[1,1,256], index: 7, kind: output, shape index: {2}]  }
   0x1   :  { %v13_v0 = vstv %s2510_s4 }
   0x2   :  { %14 = vst [vmem:[#allocation5] sm:$0x1] %v13_v0 }
   0x3   :  { %15 = vsyncpa [#allocation7], 0 }
   0x4   :  { %16 = vsyncpa [#allocation10], 0 }
   0x5   :  { %17 = vsyncpa [#allocation8], 0 }
   0x6   :  { %18 = vsyncpa [#allocation13], 0 }
   0x7   :  { %28 = vsyncadd [#allocation7], 1280  ;;  %s34_s28 = sshll.u32 %s2506_s0, 4  ;;  %s1972_s29 = smov [#allocation6]   ;;  %s35_s28 = int_to_ptr.hbm [resolvable:$true] %s34_s28 }
   0x8   :  { %s36_s30 = sshll.u32 %s1972_s29, 4  ;;  %s47_s10 = sshll.u32 %s2507_s1, 4  ;;  %s37_s30 = int_to_ptr.vmem [resolvable:$true] %s36_s30  ;;  %s48_s10 = int_to_ptr.hbm [resolvable:$true] %s47_s10 }
   0x9   :  { %s1973_s11 = smov 128   ;;  %s1974_s4 = smov 8  }
   0xa   :  { %42 = dma.hbm_to_vmem [thread:$0]  %s35_s28, 4864, %s37_s30, [#allocation7], %s1973_s11, %s1973_s11, %s1974_s4  }
   0xb   :  { %s1975_s12 = smov [#allocation9]   ;;  %s1976_s14 = smov 64  }
   0xc   :  { %s49_s13 = sshll.u32 %s1975_s12, 4  ;;  %s1977_s15 = smov 4   ;;  %s50_s13 = int_to_ptr.vmem [resolvable:$true] %s49_s13 }
   0xd   :  { %55 = dma.hbm_to_vmem [thread:$0]  %s48_s10, 2048, %s50_s13, [#allocation10], %s1976_s14, %s1976_s14, %s1977_s15  }
   0xe   :  { %1964 = dma.done.wait [#allocation7], 6144  }
   0xf   :  { %1965 = vsyncadd [#allocation7], 4294961152 }
  0x10   :  { %1966 = dma.done.wait [#allocation10], 2048  }
  0x11   :  { %1967 = vsyncadd [#allocation10], 4294965248  ;;  %v1697_v1 = vld [vmem:[#allocation9 + $0x38] sm:$0xff]  ;;  %v1696_v3 = vld [vmem:[#allocation9 + $0x30] sm:$0xff]  ;;  %vm1978_vm0 = vmmov 1   ;;  %v2514_v62 = vlaneseq  ;;  %vm1979_vm4 = vmmov 0  }
  0x12   :  { %v1705_v2 = vld [vmem:[#allocation9 + $0x78] sm:$0xff]  ;;  %951 = vmatpush.bf16.msra.mxu0 %v1697_v1  ;;  %v1704_v4 = vld [vmem:[#allocation9 + $0x70] sm:$0xff]  ;;  %1706 = vmatpush.bf16.msra.mxu2 %v1697_v1  ;;  %v1695_v5 = vld [vmem:[#allocation9 + $0x28] sm:$0xff]  ;;  %vm81_vm6 = vcmask 0   ;;  %vm1416_vm8 = vcmask 1040384   ;;  %s1595_s20 = sshll.u32 %s2512_s6, 4  ;;  %s1596_s20 = int_to_ptr.hbm [resolvable:$true] %s1595_s20 }
  0x13   :  { %1080 = vmatpush.bf16.msra.mxu1 %v1705_v2  ;;  %1714 = vmatpush.bf16.msra.mxu3 %v1705_v2  ;;  %v1703_v6 = vld [vmem:[#allocation9 + $0x68] sm:$0xff]  ;;  %v1694_v7 = vld [vmem:[#allocation9 + $0x20] sm:$0xff]  ;;  %v1693_v9 = vld [vmem:[#allocation9 + $0x18] sm:$0xff]  ;;  %s1984_s21 = smov [#allocation14]   ;;  %s1606_s25 = sshll.u32 %s2513_s7, 4  ;;  %s1607_s25 = int_to_ptr.hbm [resolvable:$true] %s1606_s25 }
  0x14   :  { %v1702_v8 = vld [vmem:[#allocation9 + $0x60] sm:$0xff]  ;;  %v1701_v10 = vld [vmem:[#allocation9 + $0x58] sm:$0xff]  ;;  %v1692_v11 = vld [vmem:[#allocation9 + $0x10] sm:$0xff]  ;;  %s1604_s22 = sshll.u32 %s1984_s21, 4  ;;  %s1985_s26 = smov [#allocation11]   ;;  %s1605_s22 = int_to_ptr.vmem [resolvable:$true] %s1604_s22 }
  0x15   :  { %v1700_v12 = vld [vmem:[#allocation9 + $0x50] sm:$0xff]  ;;  %v89_v13 = vld [vmem:[#allocation6] sm:$0xff]  ;;  %v90_v14 = vld [vmem:[#allocation6 + $0x8] sm:$0xff]  ;;  %s1582_s27 = sshll.u32 %s1985_s26, 4  ;;  %s1584_s6 = sshll.u32 %s2511_s5, 4  ;;  %s1583_s27 = int_to_ptr.vmem [resolvable:$true] %s1582_s27  ;;  %s1585_s6 = int_to_ptr.hbm [resolvable:$true] %s1584_s6 }
  0x16   :  { %952 = vmatpush.bf16.msra.mxu0 %v1696_v3  ;;  %1707 = vmatpush.bf16.msra.mxu2 %v1696_v3  ;;  %vm2035_vm1 = vmpackc.low %vm1978_vm0, %vm1978_vm0  ;;  %v1691_v16 = vld [vmem:[#allocation9 + $0x8] sm:$0xff]  ;;  %v1690_v24 = vld [vmem:[#allocation9] sm:$0xff]  ;;  %v142_v3 = vshrl.u32 %v2514_v62, 7 }
  0x17   :  { %1081 = vmatpush.bf16.msra.mxu1 %v1704_v4  ;;  %1715 = vmatpush.bf16.msra.mxu3 %v1704_v4  ;;  %v1699_v17 = vld [vmem:[#allocation9 + $0x48] sm:$0xff]  ;;  %v432_v18 = vsel %vm2035_vm1, %v89_v13, 0  ;;  %v433_v19 = vsel %vm2035_vm1, %v90_v14, 0  ;;  %v1698_v25 = vld [vmem:[#allocation9 + $0x40] sm:$0xff]  ;;  %v91_v28 = vld [vmem:[#allocation6 + $0x10] sm:$0xff] }
  0x18   :  { %v663_v20 = vunpack.c.l.b16 %v432_v18  ;;  %v665_v21 = vunpack.c.l.b16 %v433_v19  ;;  %v664_v22 = vunpack.c.h.b16 %v432_v18  ;;  %v666_v23 = vunpack.c.h.b16 %v433_v19  ;;  %v92_v29 = vld [vmem:[#allocation6 + $0x18] sm:$0xff]  ;;  %v93_v38 = vld [vmem:[#allocation6 + $0x20] sm:$0xff]  ;;  %v94_v39 = vld [vmem:[#allocation6 + $0x28] sm:$0xff] }
  0x19   :  { %v434_v30 = vsel %vm2035_vm1, %v91_v28, 0  ;;  %v435_v31 = vsel %vm2035_vm1, %v92_v29, 0  ;;  %v436_v40 = vsel %vm2035_vm1, %v93_v38, 0  ;;  %v437_v41 = vsel %vm2035_vm1, %v94_v39, 0  ;;  %v123_v48 = vld [vmem:[#allocation6 + $0x110] sm:$0xff]  ;;  %v124_v49 = vld [vmem:[#allocation6 + $0x118] sm:$0xff]  ;;  %vm2106_vm5 = vmpackc.low %vm1979_vm4, %vm1979_vm4 }
  0x1a   :  { %953 = vmatpush.bf16.msra.mxu0 %v1695_v5  ;;  %1708 = vmatpush.bf16.msra.mxu2 %v1695_v5  ;;  %v2043_v26 = vpack.c.b16 %v665_v21, %v663_v20  ;;  %v2045_v27 = vpack.c.b16 %v666_v23, %v664_v22  ;;  %v667_v32 = vunpack.c.l.b16 %v434_v30  ;;  %v669_v33 = vunpack.c.l.b16 %v435_v31  ;;  %v95_v56 = vld [vmem:[#allocation6 + $0x30] sm:$0xff]  ;;  %v96_v58 = vld [vmem:[#allocation6 + $0x38] sm:$0xff]  ;;  %v98_v18 = vld [vmem:[#allocation6 + $0x48] sm:$0xff] }
  0x1b   :  { %1082 = vmatpush.bf16.msra.mxu1 %v1703_v6  ;;  %1716 = vmatpush.bf16.msra.mxu3 %v1703_v6  ;;  %v668_v34 = vunpack.c.h.b16 %v434_v30  ;;  %v670_v35 = vunpack.c.h.b16 %v435_v31  ;;  %v671_v42 = vunpack.c.l.b16 %v436_v40  ;;  %v673_v43 = vunpack.c.l.b16 %v437_v41  ;;  %v127_v30 = vld [vmem:[#allocation6 + $0x130] sm:$0xff]  ;;  %v128_v31 = vld [vmem:[#allocation6 + $0x138] sm:$0xff] }
  0x1c   :  { %2541 = vst [vmem:[#allocation19_spill] sm:$0xff] %v2045_v27  ;;  %v2053_v36 = vpack.c.b16 %v669_v33, %v667_v32  ;;  %v672_v44 = vunpack.c.h.b16 %v436_v40  ;;  %v674_v45 = vunpack.c.h.b16 %v437_v41  ;;  %v466_v50 = vsel %vm2035_vm1, %v123_v48, 0 }
  0x1d   :  { %v2055_v37 = vpack.c.b16 %v670_v35, %v668_v34  ;;  %v2063_v46 = vpack.c.b16 %v673_v43, %v671_v42  ;;  %v467_v51 = vsel %vm2035_vm1, %v124_v49, 0  ;;  %v731_v52 = vunpack.c.l.b16 %v466_v50  ;;  %v99_v42 = vld [vmem:[#allocation6 + $0x50] sm:$0xff]  ;;  %v100_v43 = vld [vmem:[#allocation6 + $0x58] sm:$0xff] }
  0x1e   :  { %954 = vmatpush.bf16.msra.mxu0 %v1694_v7  ;;  %1709 = vmatpush.bf16.msra.mxu2 %v1694_v7  ;;  %v2065_v47 = vpack.c.b16 %v674_v45, %v672_v44  ;;  %v733_v53 = vunpack.c.l.b16 %v467_v51  ;;  %v732_v54 = vunpack.c.h.b16 %v466_v50  ;;  %v734_v55 = vunpack.c.h.b16 %v467_v51  ;;  %v125_v7 = vld [vmem:[#allocation6 + $0x120] sm:$0xff] }
  0x1f   :  { %1083 = vmatpush.bf16.msra.mxu1 %v1702_v8  ;;  %1717 = vmatpush.bf16.msra.mxu3 %v1702_v8  ;;  %2542 = vst [vmem:[#allocation20_spill] sm:$0xff] %v2055_v37  ;;  %v438_v60 = vsel %vm2035_vm1, %v95_v56, 0  ;;  %v439_v61 = vsel %vm2035_vm1, %v96_v58, 0  ;;  %v179_v4 = vadd.s32 296, %v142_v3  ;;  %v126_v8 = vld [vmem:[#allocation6 + $0x128] sm:$0xff]  ;;  %v441_v21 = vsel %vm2035_vm1, %v98_v18, 0 }
  0x20   :  { %2543 = vst [vmem:[#allocation21_spill] sm:$0xff] %v2065_v47  ;;  %v2073_v57 = vpack.c.b16 %v733_v53, %v731_v52  ;;  %v2075_v59 = vpack.c.b16 %v734_v55, %v732_v54  ;;  %v675_v63 = vunpack.c.l.b16 %v438_v60  ;;  %v677_v0 = vunpack.c.l.b16 %v439_v61  ;;  %v129_v55 = vld [vmem:[#allocation6 + $0x140] sm:$0xff]  ;;  %v130_v56 = vld [vmem:[#allocation6 + $0x148] sm:$0xff]  ;;  %v131_v18 = vld [vmem:[#allocation6 + $0x150] sm:$0xff] }
  0x21   :  { %v676_v1 = vunpack.c.h.b16 %v438_v60  ;;  %v678_v2 = vunpack.c.h.b16 %v439_v61  ;;  %vm277_vm2 = vcmp.lt.s32.totalorder %v179_v4, 300  ;;  %v681_v23 = vunpack.c.l.b16 %v441_v21  ;;  %v101_v3 = vld [vmem:[#allocation6 + $0x60] sm:$0xff]  ;;  %v102_v4 = vld [vmem:[#allocation6 + $0x68] sm:$0xff] }
  0x22   :  { %955 = vmatpush.bf16.msra.mxu0 %v1693_v9  ;;  %1710 = vmatpush.bf16.msra.mxu2 %v1693_v9  ;;  %2544 = vst [vmem:[#allocation22_spill] sm:$0xff] %v2075_v59  ;;  %v2084_v5 = vpack.c.b16 %v677_v0, %v675_v63  ;;  %vm421_vm3 = vmpackc.low %vm277_vm2, %vm277_vm2  ;;  %v468_v9 = vsel %vm2035_vm1, %v125_v7, 0  ;;  %v470_v33 = vsel %vm2106_vm5, %v127_v30, 0  ;;  %v471_v34 = vsel %vm2106_vm5, %v128_v31, 0  ;;  %v103_v30 = vld [vmem:[#allocation6 + $0x70] sm:$0xff]  ;;  %v104_v31 = vld [vmem:[#allocation6 + $0x78] sm:$0xff] }
  0x23   :  { %1084 = vmatpush.bf16.msra.mxu1 %v1701_v10  ;;  %1718 = vmatpush.bf16.msra.mxu3 %v1701_v10  ;;  %v2086_v6 = vpack.c.b16 %v678_v2, %v676_v1  ;;  %v469_v10 = vsel %vm421_vm3, %v126_v8, 0  ;;  %v736_v13 = vunpack.c.h.b16 %v468_v9  ;;  %v739_v35 = vunpack.c.l.b16 %v470_v33 }
  0x24   :  { %v738_v14 = vunpack.c.h.b16 %v469_v10  ;;  %v741_v38 = vunpack.c.l.b16 %v471_v34  ;;  %v740_v39 = vunpack.c.h.b16 %v470_v33  ;;  %v742_v40 = vunpack.c.h.b16 %v471_v34 }
  0x25   :  { %2545 = vst [vmem:[#allocation23_spill] sm:$0xff] %v2086_v6  ;;  %v442_v45 = vsel %vm2035_vm1, %v99_v42, 0  ;;  %v443_v48 = vsel %vm2035_vm1, %v100_v43, 0  ;;  %v472_v58 = vsel %vm2106_vm5, %v129_v55, 0  ;;  %v473_v60 = vsel %vm2106_vm5, %v130_v56, 0 }
  0x26   :  { %956 = vmatpush.bf16.msra.mxu0 %v1692_v11  ;;  %1711 = vmatpush.bf16.msra.mxu2 %v1692_v11  ;;  %v735_v11 = vunpack.c.l.b16 %v468_v9  ;;  %v2094_v19 = vpack.c.b16 %v738_v14, %v736_v13  ;;  %v2116_v41 = vpack.c.b16 %v741_v38, %v739_v35  ;;  %v2118_v44 = vpack.c.b16 %v742_v40, %v740_v39 }
  0x27   :  { %1085 = vmatpush.bf16.msra.mxu1 %v1700_v12  ;;  %1719 = vmatpush.bf16.msra.mxu3 %v1700_v12  ;;  %v737_v12 = vunpack.c.l.b16 %v469_v10  ;;  %v683_v49 = vunpack.c.l.b16 %v442_v45  ;;  %v685_v50 = vunpack.c.l.b16 %v443_v48  ;;  %v684_v51 = vunpack.c.h.b16 %v442_v45 }
  0x28   :  { %2546 = vst [vmem:[#allocation24_spill] sm:$0xff] %v2094_v19  ;;  %v686_v52 = vunpack.c.h.b16 %v443_v48  ;;  %v743_v61 = vunpack.c.l.b16 %v472_v58  ;;  %v745_v63 = vunpack.c.l.b16 %v473_v60  ;;  %v744_v0 = vunpack.c.h.b16 %v472_v58 }
  0x29   :  { %2550 = vst [vmem:[#allocation26_spill] sm:$0xff] %v2118_v44  ;;  %v2126_v53 = vpack.c.b16 %v685_v50, %v683_v49  ;;  %v746_v1 = vunpack.c.h.b16 %v473_v60  ;;  %v444_v8 = vsel %vm2035_vm1, %v101_v3, 0  ;;  %v445_v9 = vsel %vm2035_vm1, %v102_v4, 0  ;;  %v133_v50 = vld [vmem:[#allocation6 + $0x160] sm:$0xff] }
  0x2a   :  { %957 = vmatpush.bf16.msra.mxu0 %v1691_v16  ;;  %1712 = vmatpush.bf16.msra.mxu2 %v1691_v16  ;;  %v2092_v16 = vpack.c.b16 %v737_v12, %v735_v11  ;;  %v2128_v54 = vpack.c.b16 %v686_v52, %v684_v51  ;;  %v2136_v2 = vpack.c.b16 %v745_v63, %v743_v61  ;;  %v687_v10 = vunpack.c.l.b16 %v444_v8  ;;  %v134_v51 = vld [vmem:[#allocation6 + $0x168] sm:$0xff]  ;;  %v105_v60 = vld [vmem:[#allocation6 + $0x80] sm:$0xff] }
  0x2b   :  { %1086 = vmatpush.bf16.msra.mxu1 %v1699_v17  ;;  %1720 = vmatpush.bf16.msra.mxu3 %v1699_v17  ;;  %v97_v17 = vld [vmem:[#allocation6 + $0x40] sm:$0xff]  ;;  %v2138_v7 = vpack.c.b16 %v746_v1, %v744_v0  ;;  %v689_v11 = vunpack.c.l.b16 %v445_v9  ;;  %v688_v12 = vunpack.c.h.b16 %v444_v8  ;;  %v690_v13 = vunpack.c.h.b16 %v445_v9  ;;  %v106_v61 = vld [vmem:[#allocation6 + $0x88] sm:$0xff] }
  0x2c   :  { %v440_v20 = vsel %vm2035_vm1, %v97_v17, 0  ;;  %2551 = vst [vmem:[#allocation27_spill] sm:$0xff] %v2128_v54  ;;  %v446_v38 = vsel %vm2035_vm1, %v103_v30, 0  ;;  %v447_v39 = vsel %vm2035_vm1, %v104_v31, 0  ;;  %v476_v52 = vsel %vm2106_vm5, %v133_v50, 0  ;;  %v136_v30 = vld [vmem:[#allocation6 + $0x178] sm:$0xff] }
  0x2d   :  { %v679_v22 = vunpack.c.l.b16 %v440_v20  ;;  %2552 = vst [vmem:[#allocation28_spill] sm:$0xff] %v2138_v7  ;;  %v2146_v14 = vpack.c.b16 %v689_v11, %v687_v10  ;;  %v2148_v17 = vpack.c.b16 %v690_v13, %v688_v12  ;;  %v691_v40 = vunpack.c.l.b16 %v446_v38  ;;  %v2189_v13 = vld [vmem:[%s2508_s2] ss:$0 sm:$0xff] }
  0x2e   :  { %958 = vmatpush.bf16.msra.mxu0 %v1690_v24  ;;  %1713 = vmatpush.bf16.msra.mxu2 %v1690_v24  ;;  %v680_v24 = vunpack.c.h.b16 %v440_v20  ;;  %v132_v20 = vld [vmem:[#allocation6 + $0x158] sm:$0xff]  ;;  %v693_v42 = vunpack.c.l.b16 %v447_v39  ;;  %v692_v43 = vunpack.c.h.b16 %v446_v38  ;;  %v694_v45 = vunpack.c.h.b16 %v447_v39 }
  0x2f   :  { %1087 = vmatpush.bf16.msra.mxu1 %v1698_v25  ;;  %1721 = vmatpush.bf16.msra.mxu3 %v1698_v25  ;;  %v682_v25 = vunpack.c.h.b16 %v441_v21  ;;  %v2102_v28 = vpack.c.b16 %v681_v23, %v679_v22  ;;  %2553 = vst [vmem:[#allocation29_spill] sm:$0xff] %v2148_v17  ;;  %v474_v21 = vsel %vm2106_vm5, %v131_v18, 0  ;;  %v475_v22 = vsel %vm2106_vm5, %v132_v20, 0 }
  0x30   :  { %v747_v23 = vunpack.c.l.b16 %v474_v21  ;;  %v748_v33 = vunpack.c.h.b16 %v474_v21  ;;  %v750_v34 = vunpack.c.h.b16 %v475_v22  ;;  %v2166_v48 = vpack.c.b16 %v693_v42, %v691_v40  ;;  %v107_v40 = vld [vmem:[#allocation6 + $0x90] sm:$0xff]  ;;  %v108_v42 = vld [vmem:[#allocation6 + $0x98] sm:$0xff] }
  0x31   :  { %959 = vmatmul.bf16.vlgmr.msra.gmra.mxu0 %v2043_v26  ;;  %1044 = vmatmul.bf16.vlgmr.msra.gmra.mxu2 %v2073_v57  ;;  %v2104_v29 = vpack.c.b16 %v682_v25, %v680_v24  ;;  %v749_v24 = vunpack.c.l.b16 %v475_v22  ;;  %v2168_v49 = vpack.c.b16 %v694_v45, %v692_v43  ;;  %v477_v55 = vsel %vm2106_vm5, %v134_v51, 0 }
  0x32   :  { %1088 = vmatmul.bf16.vlgmr.msra.gmra.mxu1 %v2045_v27  ;;  %1173 = vmatmul.bf16.vlgmr.msra.gmra.mxu3 %v2075_v59  ;;  %v2159_v35 = vpack.c.b16 %v750_v34, %v748_v33  ;;  %v751_v56 = vunpack.c.l.b16 %v476_v52  ;;  %v753_v58 = vunpack.c.l.b16 %v477_v55  ;;  %v752_v0 = vunpack.c.h.b16 %v476_v52 }
  0x33   :  { %2547 = vst [vmem:[#allocation25_spill] sm:$0xff] %v2104_v29  ;;  %v2156_v25 = vpack.c.b16 %v749_v24, %v747_v23  ;;  %v754_v1 = vunpack.c.h.b16 %v477_v55  ;;  %v448_v4 = vsel %vm2035_vm1, %v105_v60, 0  ;;  %v449_v8 = vsel %vm2035_vm1, %v106_v61, 0  ;;  %v135_v24 = vld [vmem:[#allocation6 + $0x170] sm:$0xff] }
  0x34   :  { %2554 = vst [vmem:[#allocation30_spill] sm:$0xff] %v2159_v35  ;;  %v2176_v63 = vpack.c.b16 %v753_v58, %v751_v56  ;;  %v695_v9 = vunpack.c.l.b16 %v448_v4  ;;  %v697_v10 = vunpack.c.l.b16 %v449_v8  ;;  %v696_v11 = vunpack.c.h.b16 %v448_v4 }
  0x35   :  { %2555 = vst [vmem:[#allocation31_spill] sm:$0xff] %v2168_v49  ;;  %v2179_v3 = vpack.c.b16 %v754_v1, %v752_v0  ;;  %v698_v12 = vunpack.c.h.b16 %v449_v8  ;;  %v478_v31 = vsel %vm2106_vm5, %v135_v24, 0  ;;  %v479_v33 = vsel %vm2106_vm5, %v136_v30, 0  ;;  %v110_v24 = vld [vmem:[#allocation6 + $0xa8] sm:$0xff] }
  0x36   :  { %v2191_v18 = vpack.c.b16 %v697_v10, %v695_v9  ;;  %v755_v38 = vunpack.c.l.b16 %v478_v31  ;;  %v757_v39 = vunpack.c.l.b16 %v479_v33  ;;  %v756_v45 = vunpack.c.h.b16 %v478_v31 }
  0x37   :  { %2556 = vst [vmem:[#allocation32_spill] sm:$0xff] %v2179_v3  ;;  %v2193_v20 = vpack.c.b16 %v698_v12, %v696_v11  ;;  %v758_v50 = vunpack.c.h.b16 %v479_v33  ;;  %v450_v51 = vsel %vm2035_vm1, %v107_v40, 0  ;;  %v451_v56 = vsel %vm2035_vm1, %v108_v42, 0 }
  0x38   :  { %2557 = vst [vmem:[#allocation33_spill] sm:$0xff] %v2191_v18  ;;  %v2202_v43 = vpack.c.b16 %v757_v39, %v755_v38  ;;  %v699_v60 = vunpack.c.l.b16 %v450_v51  ;;  %v701_v0 = vunpack.c.l.b16 %v451_v56  ;;  %v700_v1 = vunpack.c.h.b16 %v450_v51 }
  0x39   :  { %v2207_v32 = vpack.c.b16 %v758_v50, %v756_v45  ;;  %v702_v4 = vunpack.c.h.b16 %v451_v56 }
  0x3a   :  { %v2215_v9 = vpack.c.b16 %v701_v0, %v699_v60  ;;  %v111_v0 = vld [vmem:[#allocation6 + $0xb0] sm:$0xff] }
  0x3b   :  { %2558 = vst [vmem:[#allocation34_spill] sm:$0xff] %v2207_v32  ;;  %v2217_v10 = vpack.c.b16 %v702_v4, %v700_v1  ;;  %v112_v1 = vld [vmem:[#allocation6 + $0xb8] sm:$0xff]  ;;  %v454_v4 = vsel %vm2035_vm1, %v111_v0, 0 }
  0x3c   :  { %2559 = vst [vmem:[#allocation35_spill] sm:$0xff] %v2215_v9 }
  0x41   :  { %964 = vmatmul.bf16.gmra.mxu0 %v2053_v36  ;;  %1049 = vmatmul.bf16.gmra.mxu2 %v2092_v16 }
  0x42   :  { %1093 = vmatmul.bf16.gmra.mxu1 %v2055_v37  ;;  %1178 = vmatmul.bf16.gmra.mxu3 %v2094_v19 }
  0x51   :  { %969 = vmatmul.bf16.gmra.mxu0 %v2063_v46  ;;  %1054 = vmatmul.bf16.gmra.mxu2 %v2116_v41 }
  0x52   :  { %1098 = vmatmul.bf16.gmra.mxu1 %v2065_v47  ;;  %1183 = vmatmul.bf16.gmra.mxu3 %v2118_v44 }
  0x61   :  { %974 = vmatmul.bf16.gmra.mxu0 %v2084_v5  ;;  %1059 = vmatmul.bf16.gmra.mxu2 %v2136_v2 }
  0x62   :  { %1103 = vmatmul.bf16.gmra.mxu1 %v2086_v6  ;;  %1188 = vmatmul.bf16.gmra.mxu3 %v2138_v7 }
  0x71   :  { %979 = vmatmul.bf16.gmra.mxu0 %v2102_v28  ;;  %1064 = vmatmul.bf16.gmra.mxu2 %v2156_v25 }
  0x72   :  { %1108 = vmatmul.bf16.gmra.mxu1 %v2104_v29  ;;  %1193 = vmatmul.bf16.gmra.mxu3 %v2159_v35 }
  0x81   :  { %984 = vmatmul.bf16.gmra.mxu0 %v2126_v53  ;;  %1069 = vmatmul.bf16.gmra.mxu2 %v2176_v63 }
  0x82   :  { %1113 = vmatmul.bf16.gmra.mxu1 %v2128_v54  ;;  %1198 = vmatmul.bf16.gmra.mxu3 %v2179_v3 }
  0x91   :  { %989 = vmatmul.bf16.gmra.mxu0 %v2146_v14  ;;  %1074 = vmatmul.bf16.gmra.mxu2 %v2202_v43 }
  0x92   :  { %1118 = vmatmul.bf16.gmra.mxu1 %v2148_v17  ;;  %1203 = vmatmul.bf16.gmra.mxu3 %v2207_v32 }
  0xa1   :  { %994 = vmatmul.bf16.gmra.mxu0 %v2166_v48 }
  0xa2   :  { %1123 = vmatmul.bf16.gmra.mxu1 %v2168_v49 }
  0xae   :  { %v960_v21 = vpop.f32.mrf.mxu0 }
  0xaf   :  { %v1089_v22 = vpop.f32.mrf.mxu1  ;;  %v961_v23 = vadd.f32 %v2189_v13, %v960_v21 }
  0xb1   :  { %v1090_v34 = vadd.f32 %v1089_v22, %v961_v23  ;;  %999 = vmatmul.bf16.gmra.mxu0 %v2191_v18  ;;  %v109_v23 = vld [vmem:[#allocation6 + $0xa0] sm:$0xff] }
  0xb2   :  { %1128 = vmatmul.bf16.gmra.mxu1 %v2193_v20  ;;  %v452_v30 = vsel %vm2035_vm1, %v109_v23, 0  ;;  %v707_v23 = vunpack.c.l.b16 %v454_v4 }
  0xb3   :  { %v703_v39 = vunpack.c.l.b16 %v452_v30  ;;  %v704_v45 = vunpack.c.h.b16 %v452_v30 }
  0xb6   :  { %v962_v52 = vpop.f32.mrf.mxu0 }
  0xb7   :  { %v1091_v55 = vpop.f32.mrf.mxu1  ;;  %v963_v58 = vadd.f32 %v2189_v13, %v962_v52 }
  0xb9   :  { %v1092_v61 = vadd.f32 %v1091_v55, %v963_v58 }
  0xbb   :  { %v2213_v8 = vpack.c.bf16 %v1092_v61, %v1090_v34  ;;  %v453_v34 = vsel %vm2035_vm1, %v110_v24, 0  ;;  %v1045_v24 = vpop.f32.mrf.mxu2 }
  0xbc   :  { %v705_v42 = vunpack.c.l.b16 %v453_v34  ;;  %v706_v50 = vunpack.c.h.b16 %v453_v34 }
  0xbe   :  { %v965_v11 = vpop.f32.mrf.mxu0  ;;  %v2229_v52 = vpack.c.b16 %v705_v42, %v703_v39  ;;  %v2231_v55 = vpack.c.b16 %v706_v50, %v704_v45 }
  0xbf   :  { %v1094_v12 = vpop.f32.mrf.mxu1  ;;  %v966_v21 = vadd.f32 %v2189_v13, %v965_v11 }
  0xc0   :  { %2560 = vst [vmem:[#allocation36_spill] sm:$0xff] %v2229_v52 }
  0xc1   :  { %v1095_v22 = vadd.f32 %v1094_v12, %v966_v21  ;;  %1004 = vmatmul.bf16.gmra.mxu0 %v2215_v9  ;;  %v455_v21 = vsel %vm2035_vm1, %v112_v1, 0 }
  0xc2   :  { %1133 = vmatmul.bf16.gmra.mxu1 %v2217_v10  ;;  %v710_v34 = vunpack.c.h.b16 %v455_v21 }
  0xc6   :  { %v967_v31 = vpop.f32.mrf.mxu0 }
  0xc7   :  { %v1096_v33 = vpop.f32.mrf.mxu1  ;;  %v968_v38 = vadd.f32 %v2189_v13, %v967_v31  ;;  %v709_v31 = vunpack.c.l.b16 %v455_v21 }
  0xc9   :  { %v1097_v40 = vadd.f32 %v1096_v33, %v968_v38  ;;  %v708_v33 = vunpack.c.h.b16 %v454_v4  ;;  %v1174_v38 = vpop.f32.mrf.mxu3 }
  0xcb   :  { %v2227_v51 = vpack.c.bf16 %v1097_v40, %v1095_v22  ;;  %v2243_v40 = vpack.c.b16 %v709_v31, %v707_v23  ;;  %v2245_v42 = vpack.c.b16 %v710_v34, %v708_v33 }
  0xcd   :  { %2561 = vst [vmem:[#allocation37_spill] sm:$0xff] %v2243_v40 }
  0xce   :  { %v970_v56 = vpop.f32.mrf.mxu0 }
  0xcf   :  { %v1099_v58 = vpop.f32.mrf.mxu1  ;;  %v971_v60 = vadd.f32 %v2189_v13, %v970_v56 }
  0xd1   :  { %v1100_v61 = vadd.f32 %v1099_v58, %v971_v60  ;;  %1009 = vmatmul.bf16.gmra.mxu0 %v2229_v52  ;;  %v1046_v58 = vadd.f32 %v2189_v13, %v1045_v24  ;;  %v1047_v60 = vpop.f32.mrf.mxu2 }
  0xd2   :  { %1138 = vmatmul.bf16.gmra.mxu1 %v2231_v55  ;;  %v1048_v1 = vadd.f32 %v2189_v13, %v1047_v60 }
  0xd3   :  { %v1175_v4 = vadd.f32 %v1174_v38, %v1046_v58 }
  0xd6   :  { %v972_v11 = vpop.f32.mrf.mxu0 }
  0xd7   :  { %v1101_v12 = vpop.f32.mrf.mxu1  ;;  %v973_v22 = vadd.f32 %v2189_v13, %v972_v11  ;;  %v1176_v11 = vpop.f32.mrf.mxu3 }
  0xd8   :  { %v1177_v21 = vadd.f32 %v1176_v11, %v1048_v1 }
  0xd9   :  { %v1102_v30 = vadd.f32 %v1101_v12, %v973_v22  ;;  %v114_v12 = vld [vmem:[#allocation6 + $0xc8] sm:$0xff] }
  0xda   :  { %v2254_v23 = vpack.c.bf16 %v1177_v21, %v1175_v4  ;;  %v457_v31 = vsel %vm2035_vm1, %v114_v12, 0 }
  0xdb   :  { %v2241_v39 = vpack.c.bf16 %v1102_v30, %v1100_v61  ;;  %v113_v61 = vld [vmem:[#allocation6 + $0xc0] sm:$0xff]  ;;  %v714_v58 = vunpack.c.h.b16 %v457_v31 }
  0xdc   :  { %v456_v22 = vsel %vm2035_vm1, %v113_v61, 0 }
  0xdd   :  { %v711_v34 = vunpack.c.l.b16 %v456_v22  ;;  %v712_v38 = vunpack.c.h.b16 %v456_v22 }
  0xde   :  { %v975_v45 = vpop.f32.mrf.mxu0 }
  0xdf   :  { %v1104_v50 = vpop.f32.mrf.mxu1  ;;  %v976_v56 = vadd.f32 %v2189_v13, %v975_v45  ;;  %v1050_v45 = vpop.f32.mrf.mxu2  ;;  %v2263_v61 = vpack.c.b16 %v714_v58, %v712_v38 }
  0xe0   :  { %v1179_v60 = vpop.f32.mrf.mxu3  ;;  %v1051_v12 = vadd.f32 %v2189_v13, %v1050_v45 }
  0xe1   :  { %v1105_v0 = vadd.f32 %v1104_v50, %v976_v56  ;;  %1014 = vmatmul.bf16.gmra.mxu0 %v2243_v40  ;;  %v713_v56 = vunpack.c.l.b16 %v457_v31 }
  0xe2   :  { %1143 = vmatmul.bf16.gmra.mxu1 %v2245_v42 }
  0xe3   :  { %v2261_v11 = vpack.c.b16 %v713_v56, %v711_v34 }
  0xe5   :  { %2562 = vst [vmem:[#allocation38_spill] sm:$0xff] %v2261_v11 }
  0xe6   :  { %v977_v30 = vpop.f32.mrf.mxu0 }
  0xe7   :  { %v1106_v24 = vpop.f32.mrf.mxu1  ;;  %v978_v33 = vadd.f32 %v2189_v13, %v977_v30  ;;  %v1052_v30 = vpop.f32.mrf.mxu2 }
  0xe8   :  { %v1053_v22 = vadd.f32 %v2189_v13, %v1052_v30  ;;  %v1181_v31 = vpop.f32.mrf.mxu3 }
  0xe9   :  { %v1107_v50 = vadd.f32 %v1106_v24, %v978_v33  ;;  %v1180_v24 = vadd.f32 %v1179_v60, %v1051_v12  ;;  %v116_v33 = vld [vmem:[#allocation6 + $0xd8] sm:$0xff] }
  0xea   :  { %v1182_v34 = vadd.f32 %v1181_v31, %v1053_v22 }
  0xeb   :  { %v2259_v1 = vpack.c.bf16 %v1107_v50, %v1105_v0  ;;  %v115_v0 = vld [vmem:[#allocation6 + $0xd0] sm:$0xff] }
  0xec   :  { %v458_v50 = vsel %vm2035_vm1, %v115_v0, 0  ;;  %v2272_v56 = vpack.c.bf16 %v1182_v34, %v1180_v24 }
  0xed   :  { %v716_v60 = vunpack.c.h.b16 %v458_v50 }
  0xee   :  { %v980_v4 = vpop.f32.mrf.mxu0 }
  0xef   :  { %v1109_v21 = vpop.f32.mrf.mxu1  ;;  %v981_v62 = vadd.f32 %v2189_v13, %v980_v4  ;;  %v715_v4 = vunpack.c.l.b16 %v458_v50 }
  0xf0   :  { %v1184_v44 = vpop.f32.mrf.mxu3 }
  0xf1   :  { %v1110_v59 = vadd.f32 %v1109_v21, %v981_v62  ;;  %1019 = vmatmul.bf16.gmra.mxu0 %v2261_v11  ;;  %v459_v62 = vsel %vm2035_vm1, %v116_v33, 0  ;;  %v1055_v21 = vpop.f32.mrf.mxu2 }
  0xf2   :  { %1148 = vmatmul.bf16.gmra.mxu1 %v2263_v61  ;;  %v717_v19 = vunpack.c.l.b16 %v459_v62  ;;  %v718_v12 = vunpack.c.h.b16 %v459_v62  ;;  %v1056_v33 = vadd.f32 %v2189_v13, %v1055_v21  ;;  %v117_v62 = vld [vmem:[#allocation6 + $0xe0] sm:$0xff] }
  0xf3   :  { %v460_v21 = vsel %vm2035_vm1, %v117_v62, 0 }
  0xf4   :  { %v2279_v31 = vpack.c.b16 %v717_v19, %v715_v4  ;;  %v2281_v0 = vpack.c.b16 %v718_v12, %v716_v60  ;;  %v118_v19 = vld [vmem:[#allocation6 + $0xe8] sm:$0xff]  ;;  %v719_v35 = vunpack.c.l.b16 %v460_v21 }
  0xf5   :  { %v461_v12 = vsel %vm2035_vm1, %v118_v19, 0 }
  0xf6   :  { %v982_v38 = vpop.f32.mrf.mxu0  ;;  %2563 = vst [vmem:[#allocation39_spill] sm:$0xff] %v2279_v31  ;;  %v721_v3 = vunpack.c.l.b16 %v461_v12 }
  0xf7   :  { %v1111_v45 = vpop.f32.mrf.mxu1  ;;  %v983_v58 = vadd.f32 %v2189_v13, %v982_v38 }
  0xf8   :  { %v2299_v32 = vpack.c.b16 %v721_v3, %v719_v35 }
  0xf9   :  { %v1112_v30 = vadd.f32 %v1111_v45, %v983_v58  ;;  %v1057_v38 = vpop.f32.mrf.mxu2  ;;  %v1185_v45 = vadd.f32 %v1184_v44, %v1056_v33  ;;  %v722_v44 = vunpack.c.h.b16 %v461_v12  ;;  %v120_v12 = vld [vmem:[#allocation6 + $0xf8] sm:$0xff] }
  0xfa   :  { %v1058_v50 = vadd.f32 %v2189_v13, %v1057_v38  ;;  %v720_v38 = vunpack.c.h.b16 %v460_v21  ;;  %2564 = vst [vmem:[#allocation40_spill] sm:$0xff] %v2299_v32  ;;  %v119_v21 = vld [vmem:[#allocation6 + $0xf0] sm:$0xff] }
  0xfb   :  { %v2277_v22 = vpack.c.bf16 %v1112_v30, %v1110_v59  ;;  %v1186_v59 = vpop.f32.mrf.mxu3 }
  0xfc   :  { %v1187_v58 = vadd.f32 %v1186_v59, %v1058_v50  ;;  %v2301_v50 = vpack.c.b16 %v722_v44, %v720_v38  ;;  %v462_v44 = vsel %vm2035_vm1, %v119_v21, 0 }
  0xfd   :  { %v723_v6 = vunpack.c.l.b16 %v462_v44  ;;  %v724_v54 = vunpack.c.h.b16 %v462_v44 }
  0xfe   :  { %v2283_v24 = vpop.f32.mrf.mxu0  ;;  %v2291_v4 = vpack.c.bf16 %v1187_v58, %v1185_v45 }
  0xff   :  { %v2285_v34 = vpop.f32.mrf.mxu1 }
 0x101   :  { %1024 = vmatmul.bf16.gmra.mxu0 %v2279_v31  ;;  %v1060_v7 = vpop.f32.mrf.mxu2 }
 0x102   :  { %1153 = vmatmul.bf16.gmra.mxu1 %v2281_v0  ;;  %v1061_v58 = vadd.f32 %v2189_v13, %v1060_v7  ;;  %v463_v7 = vsel %vm2035_vm1, %v120_v12, 0 }
 0x103   :  { %v1189_v33 = vpop.f32.mrf.mxu3  ;;  %v725_v29 = vunpack.c.l.b16 %v463_v7  ;;  %v726_v17 = vunpack.c.h.b16 %v463_v7 }
 0x104   :  { %v1190_v19 = vadd.f32 %v1189_v33, %v1061_v58 }
 0x105   :  { %v2315_v33 = vpack.c.b16 %v726_v17, %v724_v54 }
 0x106   :  { %v987_v30 = vpop.f32.mrf.mxu0 }
 0x107   :  { %v2293_v60 = vpop.f32.mrf.mxu1  ;;  %v988_v52 = vadd.f32 %v2189_v13, %v987_v30 }
 0x109   :  { %v1062_v27 = vpop.f32.mrf.mxu2 }
 0x10a   :  { %v1063_v62 = vadd.f32 %v2189_v13, %v1062_v27  ;;  %v2313_v27 = vpack.c.b16 %v725_v29, %v723_v6 }
 0x10b   :  { %v1191_v37 = vpop.f32.mrf.mxu3 }
 0x10c   :  { %v1192_v47 = vadd.f32 %v1191_v37, %v1063_v62 }
 0x10e   :  { %v990_v45 = vpop.f32.mrf.mxu0  ;;  %v2307_v35 = vpack.c.bf16 %v1192_v47, %v1190_v19 }
 0x10f   :  { %v1119_v59 = vpop.f32.mrf.mxu1  ;;  %v991_v6 = vadd.f32 %v2189_v13, %v990_v45  ;;  %v986_v45 = vadd.f32 %v2189_v13, %v2283_v24 }
 0x111   :  { %1029 = vmatmul.bf16.gmra.mxu0 %v2299_v32  ;;  %v2317_v47 = vpop.f32.mrf.mxu2  ;;  %v1120_v18 = vadd.f32 %v1119_v59, %v991_v6  ;;  %v122_v32 = vld [vmem:[#allocation6 + $0x108] sm:$0xff] }
 0x112   :  { %1158 = vmatmul.bf16.gmra.mxu1 %v2301_v50  ;;  %v465_v59 = vsel %vm2035_vm1, %v122_v32, 0 }
 0x113   :  { %v2321_v62 = vpop.f32.mrf.mxu3 }
 0x116   :  { %v992_v3 = vpop.f32.mrf.mxu0 }
 0x117   :  { %v1121_v38 = vpop.f32.mrf.mxu1  ;;  %v993_v19 = vadd.f32 %v2189_v13, %v992_v3 }
 0x119   :  { %v1122_v54 = vadd.f32 %v1121_v38, %v993_v19  ;;  %v2327_v49 = vpop.f32.mrf.mxu2  ;;  %v1117_v19 = vadd.f32 %v2293_v60, %v988_v52 }
 0x11b   :  { %v1215_v40 = vpack.c.bf16 %v1122_v54, %v1120_v18  ;;  %v2330_v31 = vpop.f32.mrf.mxu3  ;;  %v730_v54 = vunpack.c.h.b16 %v465_v59 }
 0x11e   :  { %v995_v58 = vpop.f32.mrf.mxu0 }
 0x11f   :  { %v1124_v37 = vpop.f32.mrf.mxu1  ;;  %v996_v21 = vadd.f32 %v2189_v13, %v995_v58  ;;  %v121_v58 = vld [vmem:[#allocation6 + $0x100] sm:$0xff] }
 0x121   :  { %1034 = vmatmul.bf16.gmra.mxu0 %v2313_v27  ;;  %v1125_v17 = vadd.f32 %v1124_v37, %v996_v21  ;;  %v464_v37 = vsel %vm2035_vm1, %v121_v58, 0  ;;  %v1245_v21 = vunpack.c.l.bf16 %v1215_v40 }
 0x122   :  { %1163 = vmatmul.bf16.gmra.mxu1 %v2315_v33  ;;  %v727_v30 = vunpack.c.l.b16 %v464_v37  ;;  %v728_v24 = vunpack.c.h.b16 %v464_v37 }
 0x124   :  { %v2346_v15 = vpack.c.b16 %v730_v54, %v728_v24 }
 0x126   :  { %v997_v12 = vpop.f32.mrf.mxu0  ;;  %2565 = vst [vmem:[#allocation41_spill] sm:$0xff] %v2346_v15 }
 0x127   :  { %v1126_v44 = vpop.f32.mrf.mxu1  ;;  %v998_v29 = vadd.f32 %v2189_v13, %v997_v12 }
 0x129   :  { %v1127_v7 = vadd.f32 %v1126_v44, %v998_v29  ;;  %v1246_v29 = vunpack.c.h.bf16 %v1215_v40 }
 0x12b   :  { %v1216_v9 = vpack.c.bf16 %v1127_v7, %v1125_v17  ;;  %v1115_v17 = vadd.f32 %v2285_v34, %v986_v45  ;;  %v2343_v7 = vpop.f32.mrf.mxu2 }
 0x12d   :  { %v1247_v11 = vunpack.c.l.bf16 %v1216_v9  ;;  %v1248_v3 = vunpack.c.h.bf16 %v1216_v9  ;;  %v729_v9 = vunpack.c.l.b16 %v465_v59 }
 0x12e   :  { %v1000_v12 = vpop.f32.mrf.mxu0 }
 0x12f   :  { %v1129_v38 = vpop.f32.mrf.mxu1  ;;  %1740 = vtanh.f32 %v1247_v11  ;;  %v1001_v18 = vadd.f32 %v2189_v13, %v1000_v12  ;;  %v2340_v6 = vpack.c.b16 %v729_v9, %v727_v30  ;;  %v1214_v11 = vpack.c.bf16 %v1117_v19, %v1115_v17  ;;  %v2350_v12 = vpop.f32.mrf.mxu3 }
 0x130   :  { %1742 = vtanh.f32 %v1248_v3 }
 0x131   :  { %v1130_v44 = vadd.f32 %v1129_v38, %v1001_v18  ;;  %1039 = vmatmul.bf16.gmra.mxu0 %v2340_v6  ;;  %1744 = vtanh.f32 %v1245_v21  ;;  %v1243_v34 = vunpack.c.l.bf16 %v1214_v11  ;;  %v1244_v38 = vunpack.c.h.bf16 %v1214_v11 }
 0x132   :  { %1746 = vtanh.f32 %v1246_v29  ;;  %1168 = vmatmul.bf16.gmra.mxu1 %v2346_v15  ;;  %v1241_v29 = vunpack.c.l.bf16 %v2277_v22 }
 0x133   :  { %1748 = vtanh.f32 %v1243_v34  ;;  %v1072_v30 = vpop.f32.mrf.mxu2  ;;  %v1239_v34 = vunpack.c.l.bf16 %v2259_v1 }
 0x134   :  { %1750 = vtanh.f32 %v1244_v38  ;;  %v1240_v38 = vunpack.c.h.bf16 %v2259_v1 }
 0x135   :  { %v1741_v32 = vpop.eup %1740  ;;  %1752 = vtanh.f32 %v1241_v29 }
 0x136   :  { %v1743_v52 = vpop.eup %1742  ;;  %v1002_v60 = vpop.f32.mrf.mxu0 }
 0x137   :  { %v1131_v3 = vpop.f32.mrf.mxu1  ;;  %v1003_v40 = vadd.f32 %v2189_v13, %v1002_v60  ;;  %v1336_v58 = vpack.c.bf16 %v1743_v52, %v1741_v32  ;;  %v1745_v37 = vpop.eup %1744  ;;  %v1242_v32 = vunpack.c.h.bf16 %v2277_v22 }
 0x138   :  { %v1747_v18 = vpop.eup %1746  ;;  %v1201_v17 = vpop.f32.mrf.mxu3 }
 0x139   :  { %v1132_v45 = vadd.f32 %v1131_v3, %v1003_v40  ;;  %1361 = vmatpush.bf16.xpose.msrb.mxu2 %v1336_v58  ;;  %v1335_v24 = vpack.c.bf16 %v1747_v18, %v1745_v37  ;;  %v1749_v11 = vpop.eup %1748  ;;  %1754 = vtanh.f32 %v1242_v32  ;;  %v1237_v32 = vunpack.c.l.bf16 %v2241_v39 }
 0x13a   :  { %v1751_v52 = vpop.eup %1750  ;;  %1756 = vtanh.f32 %v1239_v34 }
 0x13b   :  { %v2352_v59 = vpack.c.bf16 %v1132_v45, %v1130_v44  ;;  %v1334_v40 = vpack.c.bf16 %v1751_v52, %v1749_v11  ;;  %v1075_v58 = vpop.f32.mrf.mxu2  ;;  %v1753_v37 = vpop.eup %1752  ;;  %1758 = vtanh.f32 %v1240_v38 }
 0x13c   :  { %1760 = vtanh.f32 %v1237_v32  ;;  %v1071_v32 = vadd.f32 %v2189_v13, %v2343_v7  ;;  %v1234_v7 = vunpack.c.h.bf16 %v2213_v8 }
 0x13e   :  { %v1005_v9 = vpop.f32.mrf.mxu0 }
 0x13f   :  { %v1134_v19 = vpop.f32.mrf.mxu1  ;;  %v1006_v21 = vadd.f32 %v2189_v13, %v1005_v9  ;;  %v1755_v9 = vpop.eup %1754 }
 0x140   :  { %v1204_v22 = vpop.f32.mrf.mxu3  ;;  %v1333_v29 = vpack.c.bf16 %v1755_v9, %v1753_v37  ;;  %v1757_v1 = vpop.eup %1756 }
 0x141   :  { %v1135_v54 = vadd.f32 %v1134_v19, %v1006_v21  ;;  %1362 = vmatpush.bf16.xpose.msrb.mxu2 %v1335_v24 }
 0x143   :  { %v1077_v52 = vpop.f32.mrf.mxu2 }
 0x146   :  { %v1007_v44 = vpop.f32.mrf.mxu0 }
 0x147   :  { %v1136_v60 = vpop.f32.mrf.mxu1  ;;  %v1008_v3 = vadd.f32 %v2189_v13, %v1007_v44  ;;  %v1238_v44 = vunpack.c.h.bf16 %v2241_v39  ;;  %v1236_v39 = vunpack.c.h.bf16 %v2227_v51 }
 0x149   :  { %v1137_v45 = vadd.f32 %v1136_v60, %v1008_v3  ;;  %1363 = vmatpush.bf16.xpose.msrb.mxu2 %v1334_v40  ;;  %v1759_v60 = vpop.eup %1758  ;;  %v1078_v3 = vadd.f32 %v2189_v13, %v1077_v52  ;;  %v1206_v40 = vpop.f32.mrf.mxu3  ;;  %1762 = vtanh.f32 %v1238_v44  ;;  %v1073_v44 = vadd.f32 %v2189_v13, %v1072_v30 }
 0x14a   :  { %v1332_v37 = vpack.c.bf16 %v1759_v60, %v1757_v1  ;;  %v1233_v60 = vunpack.c.l.bf16 %v2213_v8 }
 0x14b   :  { %v2360_v18 = vpack.c.bf16 %v1137_v45, %v1135_v54  ;;  %v1076_v54 = vadd.f32 %v2189_v13, %v1075_v58 }
 0x14d   :  { %v1205_v9 = vadd.f32 %v1204_v22, %v1076_v54 }
 0x14e   :  { %v1010_v19 = vpop.f32.mrf.mxu0 }
 0x14f   :  { %v1139_v21 = vpop.f32.mrf.mxu1  ;;  %v1011_v24 = vadd.f32 %v2189_v13, %v1010_v19  ;;  %v1207_v19 = vadd.f32 %v1206_v40, %v1078_v3 }
 0x151   :  { %v1140_v11 = vadd.f32 %v1139_v21, %v1011_v24  ;;  %1364 = vmatpush.bf16.xpose.msrb.mxu2 %v1333_v29  ;;  %v1235_v21 = vunpack.c.l.bf16 %v2227_v51  ;;  %v1761_v29 = vpop.eup %1760  ;;  %v1232_v15 = vpack.c.bf16 %v1207_v19, %v1205_v9  ;;  %v1200_v51 = vadd.f32 %v2350_v12, %v1071_v32 }
 0x152   :  { %v1763_v52 = vpop.eup %1762  ;;  %v1068_v9 = vadd.f32 %v2189_v13, %v2327_v49 }
 0x153   :  { %1764 = vtanh.f32 %v1235_v21  ;;  %v1331_v3 = vpack.c.bf16 %v1763_v52, %v1761_v29  ;;  %v1279_v40 = vunpack.c.l.bf16 %v1232_v15 }
 0x154   :  { %1766 = vtanh.f32 %v1236_v39 }
 0x155   :  { %1768 = vtanh.f32 %v1233_v60 }
 0x156   :  { %v1012_v34 = vpop.f32.mrf.mxu0  ;;  %1770 = vtanh.f32 %v1279_v40 }
 0x157   :  { %v1141_v45 = vpop.f32.mrf.mxu1  ;;  %v1013_v38 = vadd.f32 %v2189_v13, %v1012_v34 }
 0x159   :  { %v1142_v24 = vadd.f32 %v1141_v45, %v1013_v38  ;;  %1365 = vmatpush.bf16.xpose.msrb.mxu2 %v1332_v37  ;;  %v1280_v45 = vunpack.c.h.bf16 %v1232_v15  ;;  %v1765_v30 = vpop.eup %1764  ;;  %v1066_v37 = vadd.f32 %v2189_v13, %v2317_v47 }
 0x15a   :  { %v1767_v38 = vpop.eup %1766 }
 0x15b   :  { %v2370_v58 = vpack.c.bf16 %v1142_v24, %v1140_v11  ;;  %v1202_v11 = vadd.f32 %v1201_v17, %v1073_v44  ;;  %1772 = vtanh.f32 %v1280_v45  ;;  %v1330_v15 = vpack.c.bf16 %v1767_v38, %v1765_v30  ;;  %v1769_v29 = vpop.eup %1768 }
 0x15c   :  { %1774 = vtanh.f32 %v1234_v7  ;;  %v1195_v8 = vadd.f32 %v2321_v62, %v1066_v37  ;;  %v1197_v24 = vadd.f32 %v2330_v31, %v1068_v9  ;;  %v1771_v32 = vpop.eup %1770 }
 0x15d   :  { %v1231_v19 = vpack.c.bf16 %v1202_v11, %v1200_v51 }
 0x15e   :  { %v1015_v22 = vpop.f32.mrf.mxu0 }
 0x15f   :  { %v1144_v1 = vpop.f32.mrf.mxu1  ;;  %v1016_v54 = vadd.f32 %v2189_v13, %v1015_v22  ;;  %v1277_v39 = vunpack.c.l.bf16 %v1231_v19  ;;  %v1278_v52 = vunpack.c.h.bf16 %v1231_v19 }
 0x161   :  { %v1145_v34 = vadd.f32 %v1144_v1, %v1016_v54  ;;  %1366 = vmatpush.bf16.xpose.msrb.mxu2 %v1331_v3  ;;  %v1773_v49 = vpop.eup %1772  ;;  %v1230_v1 = vpack.c.bf16 %v1197_v24, %v1195_v8  ;;  %1776 = vtanh.f32 %v1277_v39 }
 0x162   :  { %v1775_v22 = vpop.eup %1774  ;;  %1778 = vtanh.f32 %v1278_v52  ;;  %v1352_v3 = vpack.c.bf16 %v1773_v49, %v1771_v32  ;;  %v1272_v52 = vunpack.c.h.bf16 %v2291_v4 }
 0x163   :  { %v1329_v51 = vpack.c.bf16 %v1775_v22, %v1769_v29  ;;  %v1275_v31 = vunpack.c.l.bf16 %v1230_v1  ;;  %v1276_v11 = vunpack.c.h.bf16 %v1230_v1  ;;  %v1271_v29 = vunpack.c.l.bf16 %v2291_v4 }
 0x164   :  { %v1267_v4 = vunpack.c.l.bf16 %v2254_v23 }
 0x165   :  { %1780 = vtanh.f32 %v1275_v31 }
 0x166   :  { %v1017_v12 = vpop.f32.mrf.mxu0  ;;  %1782 = vtanh.f32 %v1276_v11  ;;  %v1268_v11 = vunpack.c.h.bf16 %v2254_v23 }
 0x167   :  { %v1146_v17 = vpop.f32.mrf.mxu1  ;;  %v1018_v21 = vadd.f32 %v2189_v13, %v1017_v12  ;;  %v1777_v45 = vpop.eup %1776  ;;  %v1273_v12 = vunpack.c.l.bf16 %v2307_v35 }
 0x168   :  { %v1779_v7 = vpop.eup %1778 }
 0x169   :  { %v1147_v47 = vadd.f32 %v1146_v17, %v1018_v21  ;;  %1367 = vmatpush.bf16.xpose.msrb.mxu2 %v1330_v15  ;;  %v1351_v38 = vpack.c.bf16 %v1779_v7, %v1777_v45  ;;  %v1274_v21 = vunpack.c.h.bf16 %v2307_v35  ;;  %1784 = vtanh.f32 %v1273_v12 }
 0x16a   :  { %v1269_v35 = vunpack.c.l.bf16 %v2272_v56 }
 0x16b   :  { %v2386_v44 = vpack.c.bf16 %v1147_v47, %v1145_v34  ;;  %v1781_v19 = vpop.eup %1780  ;;  %1786 = vtanh.f32 %v1274_v21 }
 0x16c   :  { %v1783_v17 = vpop.eup %1782  ;;  %1788 = vtanh.f32 %v1271_v29 }
 0x16d   :  { %v1350_v39 = vpack.c.bf16 %v1783_v17, %v1781_v19  ;;  %1790 = vtanh.f32 %v1272_v52 }
 0x16e   :  { %v1020_v60 = vpop.f32.mrf.mxu0  ;;  %1792 = vtanh.f32 %v1269_v35 }
 0x16f   :  { %v1149_v54 = vpop.f32.mrf.mxu1  ;;  %v1021_v62 = vadd.f32 %v2189_v13, %v1020_v60  ;;  %v1785_v47 = vpop.eup %1784  ;;  %v1270_v60 = vunpack.c.h.bf16 %v2272_v56 }
 0x171   :  { %v1150_v40 = vadd.f32 %v1149_v54, %v1021_v62  ;;  %1368 = vmatpush.bf16.xpose.msrb.mxu2 %v1329_v51  ;;  %v1787_v32 = vpop.eup %1786  ;;  %1794 = vtanh.f32 %v1270_v60 }
 0x172   :  { %v1349_v1 = vpack.c.bf16 %v1787_v32, %v1785_v47  ;;  %v1789_v54 = vpop.eup %1788  ;;  %1796 = vtanh.f32 %v1267_v4 }
 0x173   :  { %1798 = vtanh.f32 %v1268_v11 }
 0x176   :  { %v1022_v34 = vpop.f32.mrf.mxu0 }
 0x177   :  { %v1151_v30 = vpop.f32.mrf.mxu1  ;;  %v1023_v37 = vadd.f32 %v2189_v13, %v1022_v34 }
 0x179   :  { %1387 = vmatpush.bf16.xpose.msra.mxu2 %v1352_v3  ;;  %v1152_v9 = vadd.f32 %v1151_v30, %v1023_v37  ;;  %v1791_v3 = vpop.eup %1790 }
 0x17a   :  { %v1348_v31 = vpack.c.bf16 %v1791_v3, %v1789_v54 }
 0x17b   :  { %v2392_v15 = vpack.c.bf16 %v1152_v9, %v1150_v40  ;;  %v1793_v40 = vpop.eup %1792 }
 0x17c   :  { %v1795_v45 = vpop.eup %1794 }
 0x17d   :  { %v1347_v30 = vpack.c.bf16 %v1795_v45, %v1793_v40  ;;  %v1797_v56 = vpop.eup %1796 }
 0x17e   :  { %v1025_v8 = vpop.f32.mrf.mxu0 }
 0x17f   :  { %v1154_v24 = vpop.f32.mrf.mxu1  ;;  %v1026_v4 = vadd.f32 %v2189_v13, %v1025_v8 }
 0x181   :  { %1388 = vmatpush.bf16.xpose.msra.mxu2 %v1351_v38  ;;  %v1799_v38 = vpop.eup %1798 }
 0x182   :  { %v1346_v19 = vpack.c.bf16 %v1799_v38, %v1797_v56 }
 0x186   :  { %v1027_v49 = vpop.f32.mrf.mxu0 }
 0x187   :  { %v1156_v22 = vpop.f32.mrf.mxu1  ;;  %v1028_v60 = vadd.f32 %v2189_v13, %v1027_v49 }
 0x189   :  { %1389 = vmatpush.bf16.xpose.msra.mxu2 %v1350_v39  ;;  %v1157_v40 = vadd.f32 %v1156_v22, %v1028_v60 }
 0x18e   :  { %v1030_v62 = vpop.f32.mrf.mxu0 }
 0x18f   :  { %v1159_v51 = vpop.f32.mrf.mxu1  ;;  %v1031_v23 = vadd.f32 %v2189_v13, %v1030_v62 }
 0x191   :  { %1390 = vmatpush.bf16.xpose.msra.mxu2 %v1349_v1  ;;  %v1160_v1 = vadd.f32 %v1159_v51, %v1031_v23 }
 0x196   :  { %v1032_v7 = vpop.f32.mrf.mxu0 }
 0x197   :  { %v1161_v34 = vpop.f32.mrf.mxu1  ;;  %v1033_v12 = vadd.f32 %v2189_v13, %v1032_v7  ;;  %v1155_v7 = vadd.f32 %v1154_v24, %v1026_v4  ;;  %v1256_v4 = vunpack.c.h.bf16 %v2386_v44 }
 0x199   :  { %1391 = vmatpush.bf16.xpose.msra.mxu2 %v1348_v31  ;;  %v1162_v52 = vadd.f32 %v1161_v34, %v1033_v12  ;;  %v1222_v56 = vpack.c.bf16 %v1157_v40, %v1155_v7  ;;  %v1254_v7 = vunpack.c.h.bf16 %v2370_v58 }
 0x19b   :  { %v1223_v54 = vpack.c.bf16 %v1162_v52, %v1160_v1 }
 0x19d   :  { %v1261_v62 = vunpack.c.l.bf16 %v1223_v54  ;;  %v1262_v45 = vunpack.c.h.bf16 %v1223_v54 }
 0x19e   :  { %v1035_v37 = vpop.f32.mrf.mxu0 }
 0x19f   :  { %v1164_v9 = vpop.f32.mrf.mxu1  ;;  %v1036_v17 = vadd.f32 %v2189_v13, %v1035_v37 }
 0x1a1   :  { %1392 = vmatpush.bf16.xpose.msra.mxu2 %v1347_v30  ;;  %v1165_v47 = vadd.f32 %v1164_v9, %v1036_v17  ;;  %v1259_v9 = vunpack.c.l.bf16 %v1222_v56 }
 0x1a6   :  { %v1037_v21 = vpop.f32.mrf.mxu0 }
 0x1a7   :  { %v1038_v39 = vadd.f32 %v2189_v13, %v1037_v21  ;;  %v1166_v29 = vpop.f32.mrf.mxu1 }
 0x1a9   :  { %1393 = vmatpush.bf16.xpose.msra.mxu2 %v1346_v19  ;;  %v1167_v32 = vadd.f32 %v1166_v29, %v1038_v39  ;;  %v1260_v19 = vunpack.c.h.bf16 %v1222_v56  ;;  %v1980_v56 = vmov 0  }
 0x1aa   :  { %1736 = vset.pattern.permute.xlu0 %v1980_v56  ;;  %1737 = vset.pattern.permute.xlu1 %v1980_v56 }
 0x1ab   :  { %v1224_v35 = vpack.c.bf16 %v1167_v32, %v1165_v47  ;;  %v2411_v47 = vld [vmem:[%s2509_s3] sm:$0x1]  ;;  %v1257_v32 = vunpack.c.l.bf16 %v2392_v15  ;;  %1738 = vset.pattern.permute.xlu2 %v1980_v56  ;;  %s1983_s3 = smov [#allocation12]  }
 0x1ac   :  { %1369 = vmatmul.bf16.vlgmr.msrb.gmra.mxu2 %v2411_v47  ;;  %s1593_s17 = sshll.u32 %s1983_s3, 4  ;;  %s1594_s17 = int_to_ptr.vmem [resolvable:$true] %s1593_s17 }
 0x1ad   :  { %v1263_v3 = vunpack.c.l.bf16 %v1224_v35  ;;  %v1264_v31 = vunpack.c.h.bf16 %v1224_v35 }
 0x1ae   :  { %v1040_v11 = vpop.f32.mrf.mxu0 }
 0x1af   :  { %1800 = vtanh.f32 %v1263_v3  ;;  %v1169_v30 = vpop.f32.mrf.mxu1  ;;  %v1041_v49 = vadd.f32 %v2189_v13, %v1040_v11 }
 0x1b0   :  { %1802 = vtanh.f32 %v1264_v31  ;;  %v1255_v31 = vunpack.c.l.bf16 %v2386_v44 }
 0x1b1   :  { %1804 = vtanh.f32 %v1261_v62  ;;  %v1170_v12 = vadd.f32 %v1169_v30, %v1041_v49 }
 0x1b2   :  { %1806 = vtanh.f32 %v1262_v45  ;;  %v1253_v45 = vunpack.c.l.bf16 %v2370_v58 }
 0x1b3   :  { %1808 = vtanh.f32 %v1259_v9 }
 0x1b4   :  { %1810 = vtanh.f32 %v1260_v19 }
 0x1b5   :  { %v1801_v34 = vpop.eup %1800 }
 0x1b6   :  { %v1803_v51 = vpop.eup %1802  ;;  %v1042_v37 = vpop.f32.mrf.mxu0 }
 0x1b7   :  { %v1344_v38 = vpack.c.bf16 %v1803_v51, %v1801_v34  ;;  %v1043_v8 = vadd.f32 %v2189_v13, %v1042_v37  ;;  %v1805_v22 = vpop.eup %1804  ;;  %v1171_v17 = vpop.f32.mrf.mxu1  ;;  %v1258_v13 = vunpack.c.h.bf16 %v2392_v15  ;;  %v1251_v51 = vunpack.c.l.bf16 %v2360_v18 }
 0x1b8   :  { %v1807_v21 = vpop.eup %1806  ;;  %v1250_v37 = vunpack.c.h.bf16 %v2352_v59 }
 0x1b9   :  { %1374 = vmatpush.bf16.xpose.msrb.mxu3 %v1344_v38  ;;  %v1172_v24 = vadd.f32 %v1171_v17, %v1043_v8  ;;  %v1343_v39 = vpack.c.bf16 %v1807_v21, %v1805_v22  ;;  %v1809_v1 = vpop.eup %1808  ;;  %v1249_v38 = vunpack.c.l.bf16 %v2352_v59 }
 0x1ba   :  { %v1811_v35 = vpop.eup %1810 }
 0x1bb   :  { %v1225_v23 = vpack.c.bf16 %v1172_v24, %v1170_v12  ;;  %v1342_v60 = vpack.c.bf16 %v1811_v35, %v1809_v1 }
 0x1bd   :  { %v1265_v29 = vunpack.c.l.bf16 %v1225_v23  ;;  %v1266_v52 = vunpack.c.h.bf16 %v1225_v23 }
 0x1bf   :  { %1812 = vtanh.f32 %v1265_v29  ;;  %v1982_v29 = vmov 0.0  }
 0x1c0   :  { %1814 = vtanh.f32 %v1266_v52  ;;  %83 = vst.msk [vmem:[#allocation3] sm:$0x1] %vm81_vm6, %v1982_v29 }
 0x1c1   :  { %1375 = vmatpush.bf16.xpose.msrb.mxu3 %v1343_v39  ;;  %1816 = vtanh.f32 %v1257_v32 }
 0x1c2   :  { %1818 = vtanh.f32 %v1258_v13 }
 0x1c3   :  { %1820 = vtanh.f32 %v1255_v31 }
 0x1c4   :  { %1822 = vtanh.f32 %v1256_v4 }
 0x1c5   :  { %v1813_v54 = vpop.eup %1812  ;;  %1824 = vtanh.f32 %v1253_v45 }
 0x1c6   :  { %v1815_v3 = vpop.eup %1814  ;;  %1826 = vtanh.f32 %v1254_v7 }
 0x1c7   :  { %v1345_v11 = vpack.c.bf16 %v1815_v3, %v1813_v54  ;;  %v1817_v40 = vpop.eup %1816  ;;  %1828 = vtanh.f32 %v1251_v51 }
 0x1c8   :  { %v1819_v62 = vpop.eup %1818 }
 0x1c9   :  { %1376 = vmatpush.bf16.xpose.msrb.mxu3 %v1342_v60  ;;  %1394 = vmatpush.bf16.xpose.msra.mxu2 %v1345_v11  ;;  %v1341_v15 = vpack.c.bf16 %v1819_v62, %v1817_v40  ;;  %v1821_v30 = vpop.eup %1820 }
 0x1ca   :  { %v1823_v44 = vpop.eup %1822 }
 0x1cb   :  { %v1340_v34 = vpack.c.bf16 %v1823_v44, %v1821_v30  ;;  %v1825_v58 = vpop.eup %1824 }
 0x1cc   :  { %v1827_v49 = vpop.eup %1826 }
 0x1cd   :  { %v1829_v9 = vpop.eup %1828 }
 0x1d0   :  { %1395 = vmatmul.bf16.vlgmr.msra.gmra.mxu2 %v2411_v47 }
 0x1d1   :  { %1493 = vmatpush.bf16.msrb.mxu2 %v2202_v43  ;;  %1377 = vmatpush.bf16.xpose.msrb.mxu3 %v1341_v15  ;;  %v1354_v43 = vld [vmem:[#allocation5] sm:$0x1] }
 0x1d2   :  { %1357 = vperm.xlu0 %1736, %v1354_v43  }
 0x1d5   :  { %1494 = vmatpush.bf16.msrb.mxu2 %v2176_v63  ;;  %v1252_v63 = vunpack.c.h.bf16 %v2360_v18 }
 0x1d7   :  { %1830 = vtanh.f32 %v1252_v63  ;;  %v2576_v63 = vld [vmem:[#allocation31_spill] sm:$0xff] }
 0x1d8   :  { %1832 = vtanh.f32 %v1249_v38  ;;  %v2578_v38 = vld [vmem:[#allocation27_spill] sm:$0xff] }
 0x1d9   :  { %1495 = vmatpush.bf16.msrb.mxu2 %v2156_v25  ;;  %1378 = vmatpush.bf16.xpose.msrb.mxu3 %v1340_v34  ;;  %v1339_v25 = vpack.c.bf16 %v1827_v49, %v1825_v58  ;;  %1834 = vtanh.f32 %v1250_v37  ;;  %v2579_v37 = vld [vmem:[#allocation25_spill] sm:$0xff] }
 0x1dd   :  { %1496 = vmatpush.bf16.msrb.mxu2 %v2136_v2  ;;  %v1831_v8 = vpop.eup %1830 }
 0x1de   :  { %v1338_v2 = vpack.c.bf16 %v1831_v8, %v1829_v9  ;;  %v2580_v8 = vld [vmem:[#allocation23_spill] sm:$0xff] }
 0x1e1   :  { %1497 = vmatpush.bf16.msrb.mxu2 %v2116_v41  ;;  %1379 = vmatpush.bf16.xpose.msrb.mxu3 %v1339_v25  ;;  %v1833_v41 = vpop.eup %1832  ;;  %v2577_v25 = vld [vmem:[#allocation29_spill] sm:$0xff] }
 0x1e2   :  { %v1835_v18 = vpop.eup %1834 }
 0x1e3   :  { %v1337_v19 = vpack.c.bf16 %v1835_v18, %v1833_v41  ;;  %v2582_v41 = vld [vmem:[#allocation20_spill] sm:$0xff]  ;;  %v2583_v18 = vld [vmem:[#allocation19_spill] sm:$0xff] }
 0x1e5   :  { %1498 = vmatpush.bf16.msrb.mxu2 %v2092_v16  ;;  %v2567_v16 = vld [vmem:[#allocation39_spill] sm:$0xff] }
 0x1e9   :  { %1499 = vmatpush.bf16.msrb.mxu2 %v2073_v57  ;;  %1380 = vmatpush.bf16.xpose.msrb.mxu3 %v1338_v2  ;;  %v2566_v57 = vld [vmem:[#allocation40_spill] sm:$0xff]  ;;  %v2581_v2 = vld [vmem:[#allocation21_spill] sm:$0xff] }
 0x1ed   :  { %1500 = vmatpush.bf16.msrb.mxu2 %v2340_v6 }
 0x1f1   :  { %1519 = vmatpush.bf16.msra.mxu2 %v2315_v33  ;;  %1381 = vmatpush.bf16.xpose.msrb.mxu3 %v1337_v19  ;;  %v2584_v19 = vld [vmem:[#allocation34_spill] sm:$0xff] }
 0x1f5   :  { %1520 = vmatpush.bf16.msra.mxu2 %v2301_v50 }
 0x1f8   :  { %1382 = vmatmul.bf16.vlgmr.msrb.gmra.mxu3 %v2411_v47 }
 0x1f9   :  { %1467 = vmatpush.bf16.msra.mxu3 %v2166_v48  ;;  %1521 = vmatpush.bf16.msra.mxu2 %v2281_v0 }
 0x1fd   :  { %1468 = vmatpush.bf16.msra.mxu3 %v2146_v14  ;;  %1522 = vmatpush.bf16.msra.mxu2 %v2263_v61  ;;  %v2571_v14 = vld [vmem:[#allocation35_spill] sm:$0xff] }
 0x201   :  { %1469 = vmatpush.bf16.msra.mxu3 %v2126_v53  ;;  %1523 = vmatpush.bf16.msra.mxu2 %v2245_v42  ;;  %v2569_v53 = vld [vmem:[#allocation37_spill] sm:$0xff] }
 0x205   :  { %1470 = vmatpush.bf16.msra.mxu3 %v2102_v28  ;;  %1524 = vmatpush.bf16.msra.mxu2 %v2231_v55  ;;  %v2568_v28 = vld [vmem:[#allocation38_spill] sm:$0xff]  ;;  %v2573_v55 = vlaneseq }
 0x207   :  { %v1401_v42 = vand.u32 127, %v2573_v55  ;;  %vm2466_vm9 = vcmp.lt.s32.totalorder %v2573_v55, 256 }
 0x208   :  { %88 = vst.msk [vmem:[#allocation4] sm:$0x3] %vm2466_vm9, %v1982_v29 }
 0x209   :  { %1471 = vmatpush.bf16.msra.mxu3 %v2084_v5  ;;  %1525 = vmatpush.bf16.msra.mxu2 %v2217_v10  ;;  %v2570_v5 = vld [vmem:[#allocation36_spill] sm:$0xff]  ;;  %v1981_v10 = vmov -inf   ;;  %v1403_v0 = vadd.s32 256, %v1401_v42 }
 0x20a   :  { %82 = vst.msk [vmem:[#allocation2] sm:$0x1] %vm81_vm6, %v1981_v10 }
 0x20b   :  { %vm1411_vm7 = vcmp.lt.s32.totalorder %v1403_v0, 300 }
 0x20d   :  { %1472 = vmatpush.bf16.msra.mxu3 %v2063_v46  ;;  %1526 = vmatpush.bf16.msra.mxu2 %v2193_v20  ;;  %v2572_v46 = vld [vmem:[#allocation33_spill] sm:$0xff] }
 0x20f   :  { %v1456_v29 = vld [vmem:[#allocation4] sm:$0x3] }
 0x211   :  { %1473 = vmatpush.bf16.msra.mxu3 %v2053_v36  ;;  %v1415_v52 = vld [vmem:[#allocation2] sm:$0x1] }
 0x215   :  { %1474 = vmatpush.bf16.msra.mxu3 %v2043_v26 }
 0x219   :  { %1480 = vmatpush.bf16.msrb.mxu3 %v2313_v27 }
 0x21d   :  { %1481 = vmatpush.bf16.msrb.mxu3 %v2566_v57  ;;  %v2585_v57 = vld [vmem:[#allocation32_spill] sm:$0xff] }
 0x221   :  { %1482 = vmatpush.bf16.msrb.mxu3 %v2567_v16  ;;  %v2586_v16 = vld [vmem:[#allocation30_spill] sm:$0xff] }
 0x225   :  { %1483 = vmatpush.bf16.msrb.mxu3 %v2568_v28  ;;  %v2587_v28 = vld [vmem:[#allocation28_spill] sm:$0xff] }
 0x229   :  { %1484 = vmatpush.bf16.msrb.mxu3 %v2569_v53  ;;  %v2588_v53 = vld [vmem:[#allocation26_spill] sm:$0xff] }
 0x22d   :  { %1485 = vmatpush.bf16.msrb.mxu3 %v2570_v5  ;;  %v2589_v5 = vld [vmem:[#allocation24_spill] sm:$0xff] }
 0x22f   :  { %v1370_v48 = vpop.f32.mrf.mxu2 }
 0x231   :  { %1486 = vmatpush.bf16.msrb.mxu3 %v2571_v14  ;;  %v2590_v14 = vld [vmem:[#allocation22_spill] sm:$0xff] }
 0x235   :  { %1487 = vmatpush.bf16.msrb.mxu3 %v2572_v46  ;;  %v2591_v46 = vld [vmem:[#allocation41_spill] sm:$0xff] }
 0x237   :  { %v1372_v36 = vpop.f32.mrf.mxu2 }
 0x244   :  { %v1358_v61 = vpop.permute.xlu0 %1357 }
 0x245   :  { %v1360_v50 = vperm.slane %v1358_v61, 0 }
 0x247   :  { %v1371_v33 = vadd.f32 %v1370_v48, %v1360_v50  ;;  %v1445_v48 = vld [vmem:[#allocation3] sm:$0x1] }
 0x249   :  { %v1417_v17 = vsel %vm1416_vm8, %v1371_v33, -inf }
 0x253   :  { %v1396_v20 = vpop.f32.mrf.mxu2 }
 0x254   :  { %v1397_v27 = vadd.f32 %v1396_v20, %v1360_v50 }
 0x256   :  { %v1414_v59 = vsel %vm1411_vm7, %v1397_v27, -inf }
 0x257   :  { %v1419_v21 = vsel %vm1416_vm8, %v1414_v59, -inf }
 0x25b   :  { %v1398_v26 = vpop.f32.mrf.mxu2 }
 0x27b   :  { %v1383_v6 = vpop.f32.mrf.mxu3 }
 0x27c   :  { %v1384_v12 = vadd.f32 %v1383_v6, %v1360_v50 }
 0x27e   :  { %v1418_v22 = vsel %vm1416_vm8, %v1384_v12, -inf }
 0x27f   :  { %v1420_v24 = vmax.f32 %v1417_v17, %v1418_v22 }
 0x281   :  { %v1421_v23 = vmax.f32 %v1420_v24, %v1419_v21 }
 0x283   :  { %1422 = vmax.xlane.f32.xlu0 %v1421_v23  ;;  %v1385_v39 = vpop.f32.mrf.mxu3 }
 0x2f6   :  { %v1423_v47 = vpop.xlane.xlu0 %1422 }
 0x2f7   :  { %v1424_v32 = vmax.f32 %v1415_v52, %v1423_v47 }
 0x2f9   :  { %v1425_v13 = vsub.f32 %v1415_v52, %v1424_v32  ;;  %1444 = vst.msk [vmem:[#allocation2] sm:$0x1] %vm81_vm6, %v1424_v32  ;;  %1430 = vperm.xlu1 %1737, %v1424_v32  }
 0x2fb   :  { %v1426_v1 = vmul.f32 1.442695, %v1425_v13 }
 0x2fd   :  { %1836 = vpow2.f32 %v1426_v1 }
 0x300   :  { %v1559_v61 = vld [vmem:[#allocation2] sm:$0x1] }
 0x303   :  { %v1837_v35 = vpop.eup %1836 }
 0x304   :  { %1459 = vperm.xlu2 %1738, %v1837_v35   ;;  %v1446_v36 = vmul.f32 %v1837_v35, %v1445_v48 }
 0x35e   :  { %v1460_v17 = vpop.permute.xlu2 %1459 }
 0x35f   :  { %v1462_v23 = vperm.slane %v1460_v17, 0 }
 0x361   :  { %v1463_v13 = vmul.f32 %v1462_v23, %v1456_v29 }
 0x36b   :  { %v1431_v54 = vpop.permute.xlu1 %1430 }
 0x36c   :  { %v1433_v3 = vperm.slane %v1431_v54, 0 }
 0x36e   :  { %v1434_v31 = vsub.f32 %v1371_v33, %v1433_v3  ;;  %v1435_v4 = vsub.f32 %v1384_v12, %v1433_v3  ;;  %v1436_v11 = vsub.f32 %v1414_v59, %v1433_v3 }
 0x370   :  { %v1437_v40 = vmul.f32 1.442695, %v1434_v31  ;;  %v1439_v62 = vmul.f32 1.442695, %v1435_v4  ;;  %v1441_v15 = vmul.f32 1.442695, %v1436_v11 }
 0x372   :  { %1838 = vpow2.f32 %v1437_v40 }
 0x373   :  { %1840 = vpow2.f32 %v1439_v62 }
 0x374   :  { %1842 = vpow2.f32 %v1441_v15 }
 0x378   :  { %v1839_v45 = vpop.eup %1838 }
 0x379   :  { %v1841_v7 = vpop.eup %1840  ;;  %v1464_v30 = vpack.c.bf16 %v1839_v45, %v1839_v45  ;;  %v1447_v44 = vsel %vm1416_vm8, %v1839_v45, 0.0 }
 0x37a   :  { %v1843_v34 = vpop.eup %1842  ;;  %v1448_v56 = vsel %vm1416_vm8, %v1841_v7, 0.0  ;;  %v1465_v9 = vpack.c.bf16 %v1841_v7, %v1841_v7 }
 0x37b   :  { %1475 = vmatmul.bf16.vlgmr.msra.gmra.mxu3 %v1464_v30  ;;  %v1466_v43 = vpack.c.bf16 %v1843_v34, %v1843_v34  ;;  %v1449_v51 = vadd.f32 %v1448_v56, %v1447_v44  ;;  %v1450_v58 = vsel %vm1416_vm8, %v1843_v34, 0.0 }
 0x37c   :  { %1506 = vmatpush.bf16.msra.mxu3 %v2576_v63 }
 0x37d   :  { %1501 = vmatmul.bf16.vlgmr.msrb.gmra.mxu2 %v1466_v43  ;;  %v1451_v49 = vadd.f32 %v1450_v58, %v1449_v51 }
 0x37f   :  { %1452 = vadd.xlane.f32.xlu1 %v1451_v49 }
 0x380   :  { %1507 = vmatpush.bf16.msra.mxu3 %v2577_v25 }
 0x384   :  { %1508 = vmatpush.bf16.msra.mxu3 %v2578_v38 }
 0x388   :  { %1509 = vmatpush.bf16.msra.mxu3 %v2579_v37 }
 0x38b   :  { %1488 = vmatmul.bf16.vlgmr.msrb.gmra.mxu3 %v1465_v9 }
 0x38c   :  { %1510 = vmatpush.bf16.msra.mxu3 %v2580_v8 }
 0x38d   :  { %1527 = vmatmul.bf16.vlgmr.msra.gmra.mxu2 %v1465_v9 }
 0x390   :  { %1511 = vmatpush.bf16.msra.mxu3 %v2581_v2 }
 0x394   :  { %1512 = vmatpush.bf16.msra.mxu3 %v2582_v41 }
 0x398   :  { %1513 = vmatpush.bf16.msra.mxu3 %v2583_v18 }
 0x39b   :  { %1514 = vmatmul.bf16.vlgmr.msra.gmra.mxu3 %v1464_v30 }
 0x39c   :  { %1532 = vmatpush.bf16.msrb.mxu3 %v2584_v19 }
 0x3a0   :  { %1533 = vmatpush.bf16.msrb.mxu3 %v2585_v57 }
 0x3a4   :  { %1534 = vmatpush.bf16.msrb.mxu3 %v2586_v16 }
 0x3a8   :  { %1535 = vmatpush.bf16.msrb.mxu3 %v2587_v28 }
 0x3ac   :  { %1536 = vmatpush.bf16.msrb.mxu3 %v2588_v53 }
 0x3b0   :  { %1537 = vmatpush.bf16.msrb.mxu3 %v2589_v5 }
 0x3b4   :  { %1538 = vmatpush.bf16.msrb.mxu3 %v2590_v14 }
 0x3b8   :  { %1539 = vmatpush.bf16.msrb.mxu3 %v2591_v46 }
 0x3bb   :  { %1540 = vmatmul.bf16.vlgmr.msrb.gmra.mxu3 %v1466_v43 }
 0x3f2   :  { %v1453_v20 = vpop.xlane.xlu1 %1452 }
 0x3f3   :  { %v1454_v26 = vadd.f32 %v1453_v20, %v1446_v36 }
 0x3f5   :  { %1455 = vst.msk [vmem:[#allocation3] sm:$0x1] %vm81_vm6, %v1454_v26 }
 0x3fc   :  { %v1567_v10 = vld [vmem:[#allocation3] sm:$0x1] }
 0x3fd   :  { %1570 = vperm.xlu2 %1738, %v1567_v10  }
 0x3fe   :  { %v1476_v55 = vpop.f32.mrf.mxu3 }
 0x400   :  { %v1502_v42 = vpop.f32.mrf.mxu2 }
 0x405   :  { %1562 = vperm.xlu2 %1738, %v1559_v61  }
 0x406   :  { %v1478_v0 = vpop.f32.mrf.mxu3 }
 0x408   :  { %v1504_v50 = vpop.f32.mrf.mxu2 }
 0x40e   :  { %v1489_v27 = vpop.f32.mrf.mxu3 }
 0x40f   :  { %v1490_v21 = vadd.f32 %v1489_v27, %v1476_v55 }
 0x410   :  { %v1528_v33 = vpop.f32.mrf.mxu2 }
 0x411   :  { %v1503_v47 = vadd.f32 %v1502_v42, %v1490_v21 }
 0x416   :  { %v1491_v6 = vpop.f32.mrf.mxu3 }
 0x418   :  { %v1530_v59 = vpop.f32.mrf.mxu2 }
 0x41e   :  { %v1515_v12 = vpop.f32.mrf.mxu3 }
 0x41f   :  { %v1529_v24 = vadd.f32 %v1528_v33, %v1515_v12 }
 0x426   :  { %v1517_v22 = vpop.f32.mrf.mxu3 }
 0x43e   :  { %v1541_v39 = vpop.f32.mrf.mxu3 }
 0x43f   :  { %v1542_v52 = vadd.f32 %v1541_v39, %v1529_v24 }
 0x441   :  { %v1547_v32 = vrot.slane %v1542_v52, 7 }
 0x443   :  { %v1548_v1 = vsel %vm1416_vm8, %v1503_v47, %v1547_v32 }
 0x444   :  { %v1550_v35 = vadd.f32 %v1548_v1, %v1463_v13 }
 0x446   :  { %1555 = vst.msk [vmem:[#allocation4] sm:$0x3] %vm2466_vm9, %v1550_v35  ;;  %v1543_v54 = vpop.f32.mrf.mxu3 }
 0x44d   :  { %v1575_v3 = vld [vmem:[#allocation4] sm:$0x3] }
 0x44e   :  { %1576 = vst.msk [vmem:[#allocation14] sm:$0x3] %vm2466_vm9, %v1575_v3 }
 0x457   :  { %v1571_v31 = vpop.permute.xlu2 %1570 }
 0x458   :  { %v1573_v4 = vperm.slane %v1571_v31, 0 }
 0x45a   :  { %1574 = vst [vmem:[#allocation12] sm:$0x1] %v1573_v4 }
 0x45b   :  { %1598 = dma.vmem_to_hbm [thread:$0]  %s1594_s17, 16, %s1596_s20, [#allocation13]  }
 0x45c   :  { %1609 = dma.vmem_to_hbm [thread:$0]  %s1605_s22, 32, %s1607_s25, [#allocation13]  }
 0x45f   :  { %v1563_v60 = vpop.permute.xlu2 %1562 }
 0x460   :  { %v1565_v11 = vperm.slane %v1563_v60, 0 }
 0x462   :  { %1566 = vst [vmem:[#allocation11] sm:$0x1] %v1565_v11 }
 0x463   :  { %1587 = dma.vmem_to_hbm [thread:$0]  %s1583_s27, 16, %s1585_s6, [#allocation8]  }
 0x464   :  { %1968 = dma.done.wait [#allocation8], 16  }
 0x465   :  { %1969 = vsyncadd [#allocation8], 4294967280 }
 0x466   :  { %1970 = dma.done.wait [#allocation13], 48  }
 0x467   :  { %1971 = vsyncadd [#allocation13], 4294967248 }
 0x468   :  { %1622 = vsyncpa [#allocation7], 1 }
 0x469   :  { %1623 = vsyncpa [#allocation10], 1 }
 0x46a   :  { %1624 = vsyncpa [#allocation8], 1 }
 0x46b   :  { %1625 = vsyncpa [#allocation13], 1 }

</bundles_post_ra>
